<compile_context>
chip_gen: v6e
topology: v6e:2x2x1
jax: 0.10.0
libtpu: 0.0.40
codegen_flags: <defaults>
</compile_context>

<pallas_src>
import numpy as np
import jax
import jax.numpy as jnp
from jax.experimental import pallas as pl
from jax.experimental.pallas import tpu as pltpu


def _round_up(x, m):
    return ((x + m - 1) // m) * m


# ---------------------------------------------------------------------------
# Glue: MultiAgentTransform (host-side index plumbing only, no hot compute)
# TODO(synk): MultiAgentTransform source is not in the prompt; implemented per
# the SAIL/social-nce reference: per-human concat of relative states of all
# other humans followed by its own absolute state -> [B, N, 4*N].
# ---------------------------------------------------------------------------
def transform_frame(crowd):
    bs, nh, d = crowd.shape
    rel = crowd[:, None, :, :] - crowd[:, :, None, :]  # rel[b, i, j] = s_j - s_i
    nbr_idx = np.array([[j for j in range(nh) if j != i] for i in range(nh)])
    nbr = rel[:, np.arange(nh)[:, None], nbr_idx, :]   # [B, N, N-1, 4]
    return jnp.concatenate([nbr.reshape(bs, nh, (nh - 1) * d), crowd], axis=-1)


# ---------------------------------------------------------------------------
# Pallas kernel: one grid step = TILE_B batch rows; humans batched along M.
# ---------------------------------------------------------------------------
def sail_kernel(rt_ref, hs_ref, w_rt1_ref, w_rt2_ref, w_pa1_ref, wh1_ref,
                w64_ref, b64_ref, b128_ref, out_ref):
    relu = lambda x: jnp.maximum(x, 0.0)
    dot = lambda a, b: jnp.dot(a, b, preferred_element_type=jnp.float32)

    n_h, tb, in_dim = hs_ref.shape
    hd = w64_ref.shape[-1]                     # 64

    # Unpack weight slabs (static leading-dim indices; see pack_params layout).
    wh1 = wh1_ref[...]
    wh2, whh_s, wje = w64_ref[0], w64_ref[1], w64_ref[2]
    wp2, wa2_p = w64_ref[3], w64_ref[4]
    wjc_t, wjc_c, wpl_p = w64_ref[5], w64_ref[6], w64_ref[7]
    bh1, bh2, bhh_s, bje = b64_ref[0], b64_ref[1], b64_ref[2], b64_ref[3]
    bp2, ba2_p, bjc, bpl_p = b64_ref[4], b64_ref[5], b64_ref[6], b64_ref[7]
    b_rt1, b_rt2, b_pa1 = b128_ref[0], b128_ref[1], b128_ref[2]
    w_pa1 = w_pa1_ref[...]

    # Fused robot_encoder / task_encoder (block-diagonal, 128 lanes):
    #   lanes [0:32) robot branch, [32:64) zeros, [64:128) task branch.
    rt = rt_ref[...]                                   # [TB, 8] = (r4 | rep)
    h = relu(dot(rt, w_rt1_ref[...]) + b_rt1)          # [TB, 128]
    h = relu(dot(h, w_rt2_ref[...]) + b_rt2)           # [TB, 128]
    robot_pad = h[:, :hd]    # emb_robot in lanes 0:32, zeros in 32:64
    feat_task = h[:, hd:]    # [TB, 64]

    # Per-human pipeline, batched over humans: every matmul is [N*TB, *].
    x = hs_ref[...].reshape(n_h * tb, in_dim)          # [N*TB, 4N]
    x = relu(dot(x, wh1) + bh1)                        # [N*TB, 64]
    x = relu(dot(x, wh2) + bh2)                        # [N*TB, 64]
    eh = relu(dot(x, whh_s) + bhh_s)                   # [N*TB, 64]: emb_human in lanes 32:64

    # cat(emb_robot, emb_human) @ wje == eh @ wje + (robot_pad @ wje + bje)
    robot_bias = dot(robot_pad, wje) + bje             # [TB, 64] (hoisted, once per tile)
    robot_bias_rep = jnp.tile(robot_bias, (n_h, 1))    # [N*TB, 64]
    ep = relu(dot(eh, wje) + robot_bias_rep)           # [N*TB, 64]

    pa = relu(dot(ep, w_pa1) + b_pa1)                  # [N*TB, 128]: pairwise hid | attn hid
    fp = dot(pa[:, :hd], wp2) + bp2                    # [N*TB, 64]
    lg = dot(pa[:, hd:], wa2_p) + ba2_p                # [N*TB, 64]: logit in lane 0

    fp3 = fp.reshape(n_h, tb, hd)                      # [N, TB, 64]
    lg3 = lg.reshape(n_h, tb, hd)[:, :, 0:1]           # [N, TB, 1]

    # Stable softmax over humans (leading-axis reductions = cross-vreg VPU ops)
    # + attention-weighted crowd feature.
    m = jnp.max(lg3, axis=0)                           # [TB, 1]
    e = jnp.exp(lg3 - m[None])                         # [N, TB, 1]
    denom = jnp.sum(e, axis=0)                         # [TB, 1]
    acc = jnp.sum(fp3 * e, axis=0)                     # [TB, 64]
    feat_crowd = acc * pl.reciprocal(denom, approx=True)

    # joint_encoder (split concat-matmul) + planner (padded to 64 lanes).
    feat_joint = relu(dot(feat_task, wjc_t) + dot(feat_crowd, wjc_c) + bjc)  # [TB, 64]
    action_pad = dot(feat_joint, wpl_p) + bpl_p                              # [TB, 64]: action in lanes 0:2

    out_ref[...] = jnp.concatenate([feat_joint, action_pad], axis=1)         # [TB, 128]


# ---------------------------------------------------------------------------
# Parameter init (deterministic, torch-Linear-like uniform bounds)
# ---------------------------------------------------------------------------
def _init_linear(key, fan_in, fan_out):
    kw, kb = jax.random.split(key)
    bound = 1.0 / np.sqrt(fan_in)
    w = jax.random.uniform(kw, (fan_in, fan_out), jnp.float32, -bound, bound)
    b = jax.random.uniform(kb, (1, fan_out), jnp.float32, -bound, bound)
    return w, b


def init_params(key, num_human, embedding_dim=64, hidden_dim=64, local_dim=32):
    keys = jax.random.split(key, 14)
    p = {}
    p["wr1"], p["br1"] = _init_linear(keys[0], 4, local_dim)
    p["wr2"], p["br2"] = _init_linear(keys[1], local_dim, local_dim)
    p["wh1"], p["bh1"] = _init_linear(keys[2], 4 * num_human, hidden_dim)
    p["wh2"], p["bh2"] = _init_linear(keys[3], hidden_dim, hidden_dim)
    p["whh"], p["bhh"] = _init_linear(keys[4], hidden_dim, local_dim)
    p["wje"], p["bje"] = _init_linear(keys[5], local_dim * 2, embedding_dim)
    p["wp1"], p["bp1"] = _init_linear(keys[6], embedding_dim, hidden_dim)
    p["wp2"], p["bp2"] = _init_linear(keys[7], hidden_dim, hidden_dim)
    p["wa1"], p["ba1"] = _init_linear(keys[8], embedding_dim, hidden_dim)
    p["wa2"], p["ba2"] = _init_linear(keys[9], hidden_dim, 1)
    p["wt1"], p["bt1"] = _init_linear(keys[10], 4, hidden_dim)
    p["wt2"], p["bt2"] = _init_linear(keys[11], hidden_dim, hidden_dim)
    p["wjc"], p["bjc"] = _init_linear(keys[12], hidden_dim * 2, hidden_dim)
    p["wpl"], p["bpl"] = _init_linear(keys[13], hidden_dim, 2)
    return p


# ---------------------------------------------------------------------------
# Host-side weight packing into lane-dense fused slabs
# ---------------------------------------------------------------------------
def pack_params(params, num_human, embedding_dim=64, hidden_dim=64, local_dim=32):
    f32 = jnp.float32
    LD, HD, ED = local_dim, hidden_dim, embedding_dim
    assert ED == HD and 2 * LD == ED, "packing assumes default SAIL dims (32/64/64)"
    C = 2 * HD  # 128

    # robot_encoder (+) task_encoder, block-diagonal, 128-lane output:
    #   lanes [0:LD) robot, [LD:HD) zeros, [HD:2HD) task
    w_rt1 = jnp.zeros((8, C), f32)
    w_rt1 = w_rt1.at[0:4, 0:LD].set(params["wr1"])
    w_rt1 = w_rt1.at[4:8, HD:C].set(params["wt1"])
    b_rt1 = jnp.zeros((1, C), f32)
    b_rt1 = b_rt1.at[:, 0:LD].set(params["br1"])
    b_rt1 = b_rt1.at[:, HD:C].set(params["bt1"])

    w_rt2 = jnp.zeros((C, C), f32)
    w_rt2 = w_rt2.at[0:LD, 0:LD].set(params["wr2"])
    w_rt2 = w_rt2.at[HD:C, HD:C].set(params["wt2"])
    b_rt2 = jnp.zeros((1, C), f32)
    b_rt2 = b_rt2.at[:, 0:LD].set(params["br2"])
    b_rt2 = b_rt2.at[:, HD:C].set(params["bt2"])

    # human_head shifted so emb_human lands in lanes [LD:2LD) (concat layout).
    whh_s = jnp.zeros((HD, 2 * LD), f32).at[:, LD:2 * LD].set(params["whh"])
    bhh_s = jnp.zeros((1, 2 * LD), f32).at[:, LD:2 * LD].set(params["bhh"])

    # pairwise L1 (+) attention L1 (shared input emb_pairwise), 128 lanes.
    w_pa1 = jnp.concatenate([params["wp1"], params["wa1"]], axis=1)   # [64, 128]
    b_pa1 = jnp.concatenate([params["bp1"], params["ba1"]], axis=1)   # [1, 128]

    # attention L2 padded to 64 lanes (logit in lane 0).
    wa2_p = jnp.zeros((HD, HD), f32).at[:, 0:1].set(params["wa2"])
    ba2_p = jnp.zeros((1, HD), f32).at[:, 0:1].set(params["ba2"])

    # joint_encoder split into task-rows / crowd-rows (avoids in-kernel concat).
    wjc_t = params["wjc"][:HD]
    wjc_c = params["wjc"][HD:]

    # planner padded to 64 lanes (action in lanes 0:2).
    wpl_p = jnp.zeros((HD, HD), f32).at[:, 0:2].set(params["wpl"])
    bpl_p = jnp.zeros((1, HD), f32).at[:, 0:2].set(params["bpl"])

    w64 = jnp.stack([params["wh2"], whh_s, params["wje"], params["wp2"],
                     wa2_p, wjc_t, wjc_c, wpl_p], axis=0)              # [8, 64, 64]
    b64 = jnp.stack([params["bh1"], params["bh2"], bhh_s, params["bje"],
                     params["bp2"], ba2_p, params["bjc"], bpl_p], axis=0)  # [8, 1, 64]
    b128 = jnp.stack([b_rt1, b_rt2, b_pa1], axis=0)                    # [3, 1, 128]

    return dict(w_rt1=w_rt1, w_rt2=w_rt2, w_pa1=w_pa1,
                wh1=params["wh1"], w64=w64, b64=b64, b128=b128)


# ---------------------------------------------------------------------------
# Wrapper
# ---------------------------------------------------------------------------
def extended_network_forward(params, robot_state, crowd_obsv, *, tile_b=None,
                             embedding_dim=64, hidden_dim=64, local_dim=32):
    f32 = jnp.float32
    if robot_state.ndim < 2:
        robot_state = robot_state[None]
        crowd_obsv = crowd_obsv[None]
    robot_state = robot_state.astype(f32)
    crowd_obsv = crowd_obsv.astype(f32)

    bs = robot_state.shape[0]
    nh = crowd_obsv.shape[1]
    hd = hidden_dim

    if tile_b is None:
        tile_b = min(256, _round_up(bs, 8))        # amortize grid overhead; VMEM is tiny here
    tile_b = max(8, _round_up(tile_b, 8))
    b_pad = _round_up(bs, tile_b)

    # Inputs: (r4 | rep) packed into 8 lanes; human_state transposed human-major
    # so each grid step gets a contiguous [N, TILE_B, 4N] block.
    r4 = robot_state[:, :4]
    rep = jnp.concatenate(
        [robot_state[:, -2:] - robot_state[:, :2], robot_state[:, 2:4]], axis=1)
    rt_in = jnp.concatenate([r4, rep], axis=1)                       # [B, 8]
    hs_t = jnp.transpose(transform_frame(crowd_obsv), (1, 0, 2))     # [N, B, 4N]

    pad = b_pad - bs
    rt_in = jnp.pad(rt_in, ((0, pad), (0, 0)))
    hs_t = jnp.pad(hs_t, ((0, 0), (0, pad), (0, 0)))

    packed = pack_params(params, nh, embedding_dim, hidden_dim, local_dim)
    weights = [packed["w_rt1"], packed["w_rt2"], packed["w_pa1"],
               packed["wh1"], packed["w64"], packed["b64"], packed["b128"]]

    def full_spec(arr):
        return pl.BlockSpec(arr.shape, lambda i, _nd=arr.ndim: (0,) * _nd)

    in_specs = [
        pl.BlockSpec((tile_b, 8), lambda i: (i, 0)),                 # rt_in
        pl.BlockSpec((nh, tile_b, 4 * nh), lambda i: (0, i, 0)),     # human_state (human-major)
    ] + [full_spec(w) for w in weights]

    out_spec = pl.BlockSpec((tile_b, 2 * hd), lambda i: (i, 0))
    out_shape = jax.ShapeDtypeStruct((b_pad, 2 * hd), f32)

    slab = pl.pallas_call(
        sail_kernel,
        grid=(b_pad // tile_b,),
        in_specs=in_specs,
        out_specs=out_spec,
        out_shape=out_shape,
        compiler_params=pltpu.CompilerParams(dimension_semantics=("parallel",)),
    )(rt_in, hs_t, *weights)

    feat_joint = slab[:bs, :hd]
    action = slab[:bs, hd:hd + 2]
    return action, feat_joint


# ---------------------------------------------------------------------------
# Pure-JAX reference (direct translation of the torch forward), for sanity check
# ---------------------------------------------------------------------------
def reference_forward(params, robot_state, crowd_obsv):
    relu = jax.nn.relu
    robot_state = robot_state.astype(jnp.float32)
    crowd_obsv = crowd_obsv.astype(jnp.float32)
    r4 = robot_state[:, :4]
    emb_robot = relu(relu(r4 @ params["wr1"] + params["br1"]) @ params["wr2"] + params["br2"])
    hs = transform_frame(crowd_obsv)
    feat_human = relu(relu(hs @ params["wh1"] + params["bh1"]) @ params["wh2"] + params["bh2"])
    emb_human = relu(feat_human @ params["whh"] + params["bhh"])
    b, n, _ = emb_human.shape
    emb_cat = jnp.concatenate(
        [jnp.broadcast_to(emb_robot[:, None, :], (b, n, emb_robot.shape[-1])), emb_human], axis=-1)
    emb_pair = relu(emb_cat @ params["wje"] + params["bje"])
    feat_pair = relu(emb_pair @ params["wp1"] + params["bp1"]) @ params["wp2"] + params["bp2"]
    logit = relu(emb_pair @ params["wa1"] + params["ba1"]) @ params["wa2"] + params["ba2"]
    score = jax.nn.softmax(logit, axis=1)
    feat_crowd = jnp.sum(feat_pair * score, axis=1)
    rep = jnp.concatenate(
        [robot_state[:, -2:] - robot_state[:, :2], robot_state[:, 2:4]], axis=1)
    feat_task = relu(relu(rep @ params["wt1"] + params["bt1"]) @ params["wt2"] + params["bt2"])
    feat_joint = relu(jnp.concatenate([feat_task, feat_crowd], axis=1) @ params["wjc"] + params["bjc"])
    action = feat_joint @ params["wpl"] + params["bpl"]
    return action, feat_joint


if __name__ == "__main__":
    num_human = 5
    bs = 2
    key = jax.random.PRNGKey(0)
    kp, kr, kc = jax.random.split(key, 3)

    params = init_params(kp, num_human)
    robot_state = jax.random.normal(kr, (bs, 6), jnp.float32)            # (px,py,vx,vy,gx,gy)
    crowd_obsv = jax.random.normal(kc, (bs, num_human, 4), jnp.float32)  # (px,py,vx,vy) per human

    action, feat_joint = extended_network_forward(params, robot_state, crowd_obsv)
    jax.block_until_ready((action, feat_joint))

    assert action.shape == (bs, 2)
    assert feat_joint.shape == (bs, 64)
    assert bool(jnp.all(jnp.isfinite(action))) and bool(jnp.all(jnp.isfinite(feat_joint)))

    ref_action, ref_joint = reference_forward(params, robot_state, crowd_obsv)
    assert bool(jnp.allclose(action, ref_action, rtol=5e-2, atol=5e-2))
    assert bool(jnp.allclose(feat_joint, ref_joint, rtol=5e-2, atol=5e-2))
    print("KERNEL_OK")
</pallas_src>

<mosaic_0001>
module attributes {stable_mosaic.version = 11 : i64} {
  func.func @sail_kernel(%arg0: i32, %arg1: memref<8x8xf32, #tpu.memory_space<vmem>>, %arg2: memref<5x8x20xf32, #tpu.memory_space<vmem>>, %arg3: memref<8x128xf32, #tpu.memory_space<vmem>>, %arg4: memref<128x128xf32, #tpu.memory_space<vmem>>, %arg5: memref<64x128xf32, #tpu.memory_space<vmem>>, %arg6: memref<20x64xf32, #tpu.memory_space<vmem>>, %arg7: memref<8x64x64xf32, #tpu.memory_space<vmem>>, %arg8: memref<8x1x64xf32, #tpu.memory_space<vmem>>, %arg9: memref<3x1x128xf32, #tpu.memory_space<vmem>>, %arg10: memref<8x128xf32, #tpu.memory_space<vmem>>) attributes {dimension_semantics = [#tpu.dimension_semantics<parallel>], iteration_bounds = array<i64: 1>, scalar_prefetch = 0 : i64, scratch_operands = 0 : i64, tpu.core_type = #tpu.core_type<tc>, window_params = [{transform_indices = @transform_0, window_bounds = array<i64: 8, 8>}, {transform_indices = @transform_1, window_bounds = array<i64: 5, 8, 20>}, {pipeline_mode = #tpu.pipeline_mode<synchronous>, transform_indices = @transform_2, window_bounds = array<i64: 8, 128>}, {pipeline_mode = #tpu.pipeline_mode<synchronous>, transform_indices = @transform_3, window_bounds = array<i64: 128, 128>}, {pipeline_mode = #tpu.pipeline_mode<synchronous>, transform_indices = @transform_4, window_bounds = array<i64: 64, 128>}, {pipeline_mode = #tpu.pipeline_mode<synchronous>, transform_indices = @transform_5, window_bounds = array<i64: 20, 64>}, {pipeline_mode = #tpu.pipeline_mode<synchronous>, transform_indices = @transform_6, window_bounds = array<i64: 8, 64, 64>}, {pipeline_mode = #tpu.pipeline_mode<synchronous>, transform_indices = @transform_7, window_bounds = array<i64: 8, 1, 64>}, {pipeline_mode = #tpu.pipeline_mode<synchronous>, transform_indices = @transform_8, window_bounds = array<i64: 3, 1, 128>}, {transform_indices = @transform_9, window_bounds = array<i64: 8, 128>}]} {
    %c0 = arith.constant 0 : index
    %c0_0 = arith.constant 0 : index
    %0 = vector.load %arg6[%c0, %c0_0] : memref<20x64xf32, #tpu.memory_space<vmem>>, vector<20x64xf32>
    %c0_1 = arith.constant 0 : index
    %c0_2 = arith.constant 0 : index
    %c0_3 = arith.constant 0 : index
    %1 = vector.load %arg7[%c0_1, %c0_2, %c0_3] : memref<8x64x64xf32, #tpu.memory_space<vmem>>, vector<1x64x64xf32>
    %2 = vector.shape_cast %1 : vector<1x64x64xf32> to vector<64x64xf32>
    %c1 = arith.constant 1 : index
    %c0_4 = arith.constant 0 : index
    %c0_5 = arith.constant 0 : index
    %3 = vector.load %arg7[%c1, %c0_4, %c0_5] : memref<8x64x64xf32, #tpu.memory_space<vmem>>, vector<1x64x64xf32>
    %4 = vector.shape_cast %3 : vector<1x64x64xf32> to vector<64x64xf32>
    %c2 = arith.constant 2 : index
    %c0_6 = arith.constant 0 : index
    %c0_7 = arith.constant 0 : index
    %5 = vector.load %arg7[%c2, %c0_6, %c0_7] : memref<8x64x64xf32, #tpu.memory_space<vmem>>, vector<1x64x64xf32>
    %6 = vector.shape_cast %5 : vector<1x64x64xf32> to vector<64x64xf32>
    %c3 = arith.constant 3 : index
    %c0_8 = arith.constant 0 : index
    %c0_9 = arith.constant 0 : index
    %7 = vector.load %arg7[%c3, %c0_8, %c0_9] : memref<8x64x64xf32, #tpu.memory_space<vmem>>, vector<1x64x64xf32>
    %8 = vector.shape_cast %7 : vector<1x64x64xf32> to vector<64x64xf32>
    %c4 = arith.constant 4 : index
    %c0_10 = arith.constant 0 : index
    %c0_11 = arith.constant 0 : index
    %9 = vector.load %arg7[%c4, %c0_10, %c0_11] : memref<8x64x64xf32, #tpu.memory_space<vmem>>, vector<1x64x64xf32>
    %10 = vector.shape_cast %9 : vector<1x64x64xf32> to vector<64x64xf32>
    %c5 = arith.constant 5 : index
    %c0_12 = arith.constant 0 : index
    %c0_13 = arith.constant 0 : index
    %11 = vector.load %arg7[%c5, %c0_12, %c0_13] : memref<8x64x64xf32, #tpu.memory_space<vmem>>, vector<1x64x64xf32>
    %12 = vector.shape_cast %11 : vector<1x64x64xf32> to vector<64x64xf32>
    %c6 = arith.constant 6 : index
    %c0_14 = arith.constant 0 : index
    %c0_15 = arith.constant 0 : index
    %13 = vector.load %arg7[%c6, %c0_14, %c0_15] : memref<8x64x64xf32, #tpu.memory_space<vmem>>, vector<1x64x64xf32>
    %14 = vector.shape_cast %13 : vector<1x64x64xf32> to vector<64x64xf32>
    %c7 = arith.constant 7 : index
    %c0_16 = arith.constant 0 : index
    %c0_17 = arith.constant 0 : index
    %15 = vector.load %arg7[%c7, %c0_16, %c0_17] : memref<8x64x64xf32, #tpu.memory_space<vmem>>, vector<1x64x64xf32>
    %16 = vector.shape_cast %15 : vector<1x64x64xf32> to vector<64x64xf32>
    %c0_18 = arith.constant 0 : index
    %c0_19 = arith.constant 0 : index
    %c0_20 = arith.constant 0 : index
    %17 = vector.load %arg8[%c0_18, %c0_19, %c0_20] : memref<8x1x64xf32, #tpu.memory_space<vmem>>, vector<1x1x64xf32>
    %18 = vector.shape_cast %17 : vector<1x1x64xf32> to vector<1x64xf32>
    %c1_21 = arith.constant 1 : index
    %c0_22 = arith.constant 0 : index
    %c0_23 = arith.constant 0 : index
    %19 = vector.load %arg8[%c1_21, %c0_22, %c0_23] : memref<8x1x64xf32, #tpu.memory_space<vmem>>, vector<1x1x64xf32>
    %20 = vector.shape_cast %19 : vector<1x1x64xf32> to vector<1x64xf32>
    %c2_24 = arith.constant 2 : index
    %c0_25 = arith.constant 0 : index
    %c0_26 = arith.constant 0 : index
    %21 = vector.load %arg8[%c2_24, %c0_25, %c0_26] : memref<8x1x64xf32, #tpu.memory_space<vmem>>, vector<1x1x64xf32>
    %22 = vector.shape_cast %21 : vector<1x1x64xf32> to vector<1x64xf32>
    %c3_27 = arith.constant 3 : index
    %c0_28 = arith.constant 0 : index
    %c0_29 = arith.constant 0 : index
    %23 = vector.load %arg8[%c3_27, %c0_28, %c0_29] : memref<8x1x64xf32, #tpu.memory_space<vmem>>, vector<1x1x64xf32>
    %24 = vector.shape_cast %23 : vector<1x1x64xf32> to vector<1x64xf32>
    %c4_30 = arith.constant 4 : index
    %c0_31 = arith.constant 0 : index
    %c0_32 = arith.constant 0 : index
    %25 = vector.load %arg8[%c4_30, %c0_31, %c0_32] : memref<8x1x64xf32, #tpu.memory_space<vmem>>, vector<1x1x64xf32>
    %26 = vector.shape_cast %25 : vector<1x1x64xf32> to vector<1x64xf32>
    %c5_33 = arith.constant 5 : index
    %c0_34 = arith.constant 0 : index
    %c0_35 = arith.constant 0 : index
    %27 = vector.load %arg8[%c5_33, %c0_34, %c0_35] : memref<8x1x64xf32, #tpu.memory_space<vmem>>, vector<1x1x64xf32>
    %28 = vector.shape_cast %27 : vector<1x1x64xf32> to vector<1x64xf32>
    %c6_36 = arith.constant 6 : index
    %c0_37 = arith.constant 0 : index
    %c0_38 = arith.constant 0 : index
    %29 = vector.load %arg8[%c6_36, %c0_37, %c0_38] : memref<8x1x64xf32, #tpu.memory_space<vmem>>, vector<1x1x64xf32>
    %30 = vector.shape_cast %29 : vector<1x1x64xf32> to vector<1x64xf32>
    %c7_39 = arith.constant 7 : index
    %c0_40 = arith.constant 0 : index
    %c0_41 = arith.constant 0 : index
    %31 = vector.load %arg8[%c7_39, %c0_40, %c0_41] : memref<8x1x64xf32, #tpu.memory_space<vmem>>, vector<1x1x64xf32>
    %32 = vector.shape_cast %31 : vector<1x1x64xf32> to vector<1x64xf32>
    %c0_42 = arith.constant 0 : index
    %c0_43 = arith.constant 0 : index
    %c0_44 = arith.constant 0 : index
    %33 = vector.load %arg9[%c0_42, %c0_43, %c0_44] : memref<3x1x128xf32, #tpu.memory_space<vmem>>, vector<1x1x128xf32>
    %34 = vector.shape_cast %33 : vector<1x1x128xf32> to vector<1x128xf32>
    %c1_45 = arith.constant 1 : index
    %c0_46 = arith.constant 0 : index
    %c0_47 = arith.constant 0 : index
    %35 = vector.load %arg9[%c1_45, %c0_46, %c0_47] : memref<3x1x128xf32, #tpu.memory_space<vmem>>, vector<1x1x128xf32>
    %36 = vector.shape_cast %35 : vector<1x1x128xf32> to vector<1x128xf32>
    %c2_48 = arith.constant 2 : index
    %c0_49 = arith.constant 0 : index
    %c0_50 = arith.constant 0 : index
    %37 = vector.load %arg9[%c2_48, %c0_49, %c0_50] : memref<3x1x128xf32, #tpu.memory_space<vmem>>, vector<1x1x128xf32>
    %38 = vector.shape_cast %37 : vector<1x1x128xf32> to vector<1x128xf32>
    %c0_51 = arith.constant 0 : index
    %c0_52 = arith.constant 0 : index
    %39 = vector.load %arg5[%c0_51, %c0_52] : memref<64x128xf32, #tpu.memory_space<vmem>>, vector<64x128xf32>
    %c0_53 = arith.constant 0 : index
    %c0_54 = arith.constant 0 : index
    %40 = vector.load %arg1[%c0_53, %c0_54] : memref<8x8xf32, #tpu.memory_space<vmem>>, vector<8x8xf32>
    %c0_55 = arith.constant 0 : index
    %c0_56 = arith.constant 0 : index
    %41 = vector.load %arg3[%c0_55, %c0_56] : memref<8x128xf32, #tpu.memory_space<vmem>>, vector<8x128xf32>
    %cst = arith.constant dense<0.000000e+00> : vector<8x128xf32>
    %42 = tpu.matmul %40, %41, %cst {dimension_numbers = #tpu.dot_dimension_numbers<[1], [0], [0], [1], [0, 0, 1, 1], [], []>} : vector<8x8xf32>, vector<8x128xf32>, vector<8x128xf32> -> vector<8x128xf32>
    %43 = vector.broadcast %34 : vector<1x128xf32> to vector<8x128xf32>
    %44 = arith.addf %42, %43 : vector<8x128xf32>
    %cst_57 = arith.constant 0.000000e+00 : f32
    %45 = vector.broadcast %cst_57 : f32 to vector<8x128xf32>
    %46 = arith.maximumf %44, %45 : vector<8x128xf32>
    %c0_58 = arith.constant 0 : index
    %c0_59 = arith.constant 0 : index
    %47 = vector.load %arg4[%c0_58, %c0_59] : memref<128x128xf32, #tpu.memory_space<vmem>>, vector<128x128xf32>
    %cst_60 = arith.constant dense<0.000000e+00> : vector<8x128xf32>
    %48 = tpu.matmul %46, %47, %cst_60 {dimension_numbers = #tpu.dot_dimension_numbers<[1], [0], [0], [1], [0, 0, 1, 1], [], []>} : vector<8x128xf32>, vector<128x128xf32>, vector<8x128xf32> -> vector<8x128xf32>
    %49 = vector.broadcast %36 : vector<1x128xf32> to vector<8x128xf32>
    %50 = arith.addf %48, %49 : vector<8x128xf32>
    %cst_61 = arith.constant 0.000000e+00 : f32
    %51 = vector.broadcast %cst_61 : f32 to vector<8x128xf32>
    %52 = arith.maximumf %50, %51 : vector<8x128xf32>
    %53 = vector.extract_strided_slice %52 {offsets = [0, 0], sizes = [8, 64], strides = [1, 1]} : vector<8x128xf32> to vector<8x64xf32>
    %54 = vector.extract_strided_slice %52 {offsets = [0, 64], sizes = [8, 64], strides = [1, 1]} : vector<8x128xf32> to vector<8x64xf32>
    %c0_62 = arith.constant 0 : index
    %c0_63 = arith.constant 0 : index
    %c0_64 = arith.constant 0 : index
    %55 = vector.load %arg2[%c0_62, %c0_63, %c0_64] : memref<5x8x20xf32, #tpu.memory_space<vmem>>, vector<5x8x20xf32>
    %56 = vector.shape_cast %55 : vector<5x8x20xf32> to vector<40x20xf32>
    %cst_65 = arith.constant dense<0.000000e+00> : vector<40x64xf32>
    %57 = tpu.matmul %56, %0, %cst_65 {dimension_numbers = #tpu.dot_dimension_numbers<[1], [0], [0], [1], [0, 0, 1, 1], [], []>} : vector<40x20xf32>, vector<20x64xf32>, vector<40x64xf32> -> vector<40x64xf32>
    %58 = vector.broadcast %18 : vector<1x64xf32> to vector<40x64xf32>
    %59 = arith.addf %57, %58 : vector<40x64xf32>
    %cst_66 = arith.constant 0.000000e+00 : f32
    %60 = vector.broadcast %cst_66 : f32 to vector<40x64xf32>
    %61 = arith.maximumf %59, %60 : vector<40x64xf32>
    %cst_67 = arith.constant dense<0.000000e+00> : vector<40x64xf32>
    %62 = tpu.matmul %61, %2, %cst_67 {dimension_numbers = #tpu.dot_dimension_numbers<[1], [0], [0], [1], [0, 0, 1, 1], [], []>} : vector<40x64xf32>, vector<64x64xf32>, vector<40x64xf32> -> vector<40x64xf32>
    %63 = vector.broadcast %20 : vector<1x64xf32> to vector<40x64xf32>
    %64 = arith.addf %62, %63 : vector<40x64xf32>
    %cst_68 = arith.constant 0.000000e+00 : f32
    %65 = vector.broadcast %cst_68 : f32 to vector<40x64xf32>
    %66 = arith.maximumf %64, %65 : vector<40x64xf32>
    %cst_69 = arith.constant dense<0.000000e+00> : vector<40x64xf32>
    %67 = tpu.matmul %66, %4, %cst_69 {dimension_numbers = #tpu.dot_dimension_numbers<[1], [0], [0], [1], [0, 0, 1, 1], [], []>} : vector<40x64xf32>, vector<64x64xf32>, vector<40x64xf32> -> vector<40x64xf32>
    %68 = vector.broadcast %22 : vector<1x64xf32> to vector<40x64xf32>
    %69 = arith.addf %67, %68 : vector<40x64xf32>
    %cst_70 = arith.constant 0.000000e+00 : f32
    %70 = vector.broadcast %cst_70 : f32 to vector<40x64xf32>
    %71 = arith.maximumf %69, %70 : vector<40x64xf32>
    %cst_71 = arith.constant dense<0.000000e+00> : vector<8x64xf32>
    %72 = tpu.matmul %53, %6, %cst_71 {dimension_numbers = #tpu.dot_dimension_numbers<[1], [0], [0], [1], [0, 0, 1, 1], [], []>} : vector<8x64xf32>, vector<64x64xf32>, vector<8x64xf32> -> vector<8x64xf32>
    %73 = vector.broadcast %24 : vector<1x64xf32> to vector<8x64xf32>
    %74 = arith.addf %72, %73 : vector<8x64xf32>
    %75 = tpu.concatenate %74, %74, %74, %74, %74 in 0 : vector<8x64xf32>, vector<8x64xf32>, vector<8x64xf32>, vector<8x64xf32>, vector<8x64xf32> -> vector<40x64xf32>
    %cst_72 = arith.constant dense<0.000000e+00> : vector<40x64xf32>
    %76 = tpu.matmul %71, %6, %cst_72 {dimension_numbers = #tpu.dot_dimension_numbers<[1], [0], [0], [1], [0, 0, 1, 1], [], []>} : vector<40x64xf32>, vector<64x64xf32>, vector<40x64xf32> -> vector<40x64xf32>
    %77 = arith.addf %76, %75 : vector<40x64xf32>
    %cst_73 = arith.constant 0.000000e+00 : f32
    %78 = vector.broadcast %cst_73 : f32 to vector<40x64xf32>
    %79 = arith.maximumf %77, %78 : vector<40x64xf32>
    %cst_74 = arith.constant dense<0.000000e+00> : vector<40x128xf32>
    %80 = tpu.matmul %79, %39, %cst_74 {dimension_numbers = #tpu.dot_dimension_numbers<[1], [0], [0], [1], [0, 0, 1, 1], [], []>} : vector<40x64xf32>, vector<64x128xf32>, vector<40x128xf32> -> vector<40x128xf32>
    %81 = vector.broadcast %38 : vector<1x128xf32> to vector<40x128xf32>
    %82 = arith.addf %80, %81 : vector<40x128xf32>
    %cst_75 = arith.constant 0.000000e+00 : f32
    %83 = vector.broadcast %cst_75 : f32 to vector<40x128xf32>
    %84 = arith.maximumf %82, %83 : vector<40x128xf32>
    %85 = vector.extract_strided_slice %84 {offsets = [0, 0], sizes = [40, 64], strides = [1, 1]} : vector<40x128xf32> to vector<40x64xf32>
    %cst_76 = arith.constant dense<0.000000e+00> : vector<40x64xf32>
    %86 = tpu.matmul %85, %8, %cst_76 {dimension_numbers = #tpu.dot_dimension_numbers<[1], [0], [0], [1], [0, 0, 1, 1], [], []>} : vector<40x64xf32>, vector<64x64xf32>, vector<40x64xf32> -> vector<40x64xf32>
    %87 = vector.broadcast %26 : vector<1x64xf32> to vector<40x64xf32>
    %88 = arith.addf %86, %87 : vector<40x64xf32>
    %89 = vector.extract_strided_slice %84 {offsets = [0, 64], sizes = [40, 64], strides = [1, 1]} : vector<40x128xf32> to vector<40x64xf32>
    %cst_77 = arith.constant dense<0.000000e+00> : vector<40x64xf32>
    %90 = tpu.matmul %89, %10, %cst_77 {dimension_numbers = #tpu.dot_dimension_numbers<[1], [0], [0], [1], [0, 0, 1, 1], [], []>} : vector<40x64xf32>, vector<64x64xf32>, vector<40x64xf32> -> vector<40x64xf32>
    %91 = vector.broadcast %28 : vector<1x64xf32> to vector<40x64xf32>
    %92 = arith.addf %90, %91 : vector<40x64xf32>
    %93 = vector.shape_cast %88 : vector<40x64xf32> to vector<5x8x64xf32>
    %94 = vector.shape_cast %92 : vector<40x64xf32> to vector<5x8x64xf32>
    %95 = vector.extract_strided_slice %94 {offsets = [0, 0, 0], sizes = [5, 8, 1], strides = [1, 1, 1]} : vector<5x8x64xf32> to vector<5x8x1xf32>
    %cst_78 = arith.constant dense<0xFF800000> : vector<8x1xf32>
    %96 = vector.multi_reduction <maximumf>, %95, %cst_78 [0] : vector<5x8x1xf32> to vector<8x1xf32>
    %97 = vector.shape_cast %96 : vector<8x1xf32> to vector<1x8x1xf32>
    %98 = vector.broadcast %97 : vector<1x8x1xf32> to vector<5x8x1xf32>
    %99 = arith.subf %95, %98 : vector<5x8x1xf32>
    %100 = math.exp %99 : vector<5x8x1xf32>
    %cst_79 = arith.constant dense<0.000000e+00> : vector<8x1xf32>
    %101 = vector.multi_reduction <add>, %100, %cst_79 [0] : vector<5x8x1xf32> to vector<8x1xf32>
    %102 = vector.broadcast %100 : vector<5x8x1xf32> to vector<5x8x64xf32>
    %103 = arith.mulf %93, %102 : vector<5x8x64xf32>
    %cst_80 = arith.constant dense<0.000000e+00> : vector<8x64xf32>
    %104 = vector.multi_reduction <add>, %103, %cst_80 [0] : vector<5x8x64xf32> to vector<8x64xf32>
    %105 = tpu.reciprocal %101 {approx = true} : vector<8x1xf32> -> vector<8x1xf32>
    %106 = vector.broadcast %105 : vector<8x1xf32> to vector<8x64xf32>
    %107 = arith.mulf %104, %106 : vector<8x64xf32>
    %cst_81 = arith.constant dense<0.000000e+00> : vector<8x64xf32>
    %108 = tpu.matmul %54, %12, %cst_81 {dimension_numbers = #tpu.dot_dimension_numbers<[1], [0], [0], [1], [0, 0, 1, 1], [], []>} : vector<8x64xf32>, vector<64x64xf32>, vector<8x64xf32> -> vector<8x64xf32>
    %cst_82 = arith.constant dense<0.000000e+00> : vector<8x64xf32>
    %109 = tpu.matmul %107, %14, %cst_82 {dimension_numbers = #tpu.dot_dimension_numbers<[1], [0], [0], [1], [0, 0, 1, 1], [], []>} : vector<8x64xf32>, vector<64x64xf32>, vector<8x64xf32> -> vector<8x64xf32>
    %110 = arith.addf %108, %109 : vector<8x64xf32>
    %111 = vector.broadcast %30 : vector<1x64xf32> to vector<8x64xf32>
    %112 = arith.addf %110, %111 : vector<8x64xf32>
    %cst_83 = arith.constant 0.000000e+00 : f32
    %113 = vector.broadcast %cst_83 : f32 to vector<8x64xf32>
    %114 = arith.maximumf %112, %113 : vector<8x64xf32>
    %cst_84 = arith.constant dense<0.000000e+00> : vector<8x64xf32>
    %115 = tpu.matmul %114, %16, %cst_84 {dimension_numbers = #tpu.dot_dimension_numbers<[1], [0], [0], [1], [0, 0, 1, 1], [], []>} : vector<8x64xf32>, vector<64x64xf32>, vector<8x64xf32> -> vector<8x64xf32>
    %116 = vector.broadcast %32 : vector<1x64xf32> to vector<8x64xf32>
    %117 = arith.addf %115, %116 : vector<8x64xf32>
    %118 = tpu.concatenate %114, %117 in 1 : vector<8x64xf32>, vector<8x64xf32> -> vector<8x128xf32>
    %c0_85 = arith.constant 0 : index
    %c0_86 = arith.constant 0 : index
    %119 = vector.load %arg10[%c0_85, %c0_86] : memref<8x128xf32, #tpu.memory_space<vmem>>, vector<8x128xf32>
    tpu.vector_store %arg10[%c0_85, %c0_86], %118 {strides = array<i32>} : memref<8x128xf32, #tpu.memory_space<vmem>>, vector<8x128xf32>,
    return
  }
  func.func @transform_0(%arg0: i32) -> (i32, i32) {
    %c0_i32 = arith.constant 0 : i32
    %c0_i32_0 = arith.constant 0 : i32
    return %arg0, %c0_i32 : i32, i32
  }
  func.func @transform_1(%arg0: i32) -> (i32, i32, i32) {
    %c0_i32 = arith.constant 0 : i32
    %c0_i32_0 = arith.constant 0 : i32
    %c0_i32_1 = arith.constant 0 : i32
    return %c0_i32, %arg0, %c0_i32_0 : i32, i32, i32
  }
  func.func @transform_2(%arg0: i32) -> (i32, i32) {
    %c0_i32 = arith.constant 0 : i32
    %c0_i32_0 = arith.constant 0 : i32
    %c0_i32_1 = arith.constant 0 : i32
    return %c0_i32, %c0_i32_0 : i32, i32
  }
  func.func @transform_3(%arg0: i32) -> (i32, i32) {
    %c0_i32 = arith.constant 0 : i32
    %c0_i32_0 = arith.constant 0 : i32
    %c0_i32_1 = arith.constant 0 : i32
    return %c0_i32, %c0_i32_0 : i32, i32
  }
  func.func @transform_4(%arg0: i32) -> (i32, i32) {
    %c0_i32 = arith.constant 0 : i32
    %c0_i32_0 = arith.constant 0 : i32
    %c0_i32_1 = arith.constant 0 : i32
    return %c0_i32, %c0_i32_0 : i32, i32
  }
  func.func @transform_5(%arg0: i32) -> (i32, i32) {
    %c0_i32 = arith.constant 0 : i32
    %c0_i32_0 = arith.constant 0 : i32
    %c0_i32_1 = arith.constant 0 : i32
    return %c0_i32, %c0_i32_0 : i32, i32
  }
  func.func @transform_6(%arg0: i32) -> (i32, i32, i32) {
    %c0_i32 = arith.constant 0 : i32
    %c0_i32_0 = arith.constant 0 : i32
    %c0_i32_1 = arith.constant 0 : i32
    %c0_i32_2 = arith.constant 0 : i32
    return %c0_i32, %c0_i32_0, %c0_i32_1 : i32, i32, i32
  }
  func.func @transform_7(%arg0: i32) -> (i32, i32, i32) {
    %c0_i32 = arith.constant 0 : i32
    %c0_i32_0 = arith.constant 0 : i32
    %c0_i32_1 = arith.constant 0 : i32
    %c0_i32_2 = arith.constant 0 : i32
    return %c0_i32, %c0_i32_0, %c0_i32_1 : i32, i32, i32
  }
  func.func @transform_8(%arg0: i32) -> (i32, i32, i32) {
    %c0_i32 = arith.constant 0 : i32
    %c0_i32_0 = arith.constant 0 : i32
    %c0_i32_1 = arith.constant 0 : i32
    %c0_i32_2 = arith.constant 0 : i32
    return %c0_i32, %c0_i32_0, %c0_i32_1 : i32, i32, i32
  }
  func.func @transform_9(%arg0: i32) -> (i32, i32) {
    %c0_i32 = arith.constant 0 : i32
    %c0_i32_0 = arith.constant 0 : i32
    return %arg0, %c0_i32 : i32, i32
  }
}

</mosaic_0001>

<bundles_post_ra>
// kernel: tpu_custom_call.1
= control target key start
LH: loop header
LB: loop body
LE: loop exit
PB: predicated region body
PF: predicated region fallthrough
CT: control target
= control target key end

     0   :  { %14 = vsyncpa [#allocation3], 0  ;;  %s2776_s0 = inlined_call_operand.hbm [shape: f32[8,8], index: 0, kind: input, shape index: {}]   ;;  %s2777_s1 = inlined_call_operand.hbm [shape: f32[5,8,20], index: 1, kind: input, shape index: {}]   ;;  %s2778_s2 = inlined_call_operand.hbm [shape: f32[8,128], index: 2, kind: input, shape index: {}]   ;;  %s2779_s3 = inlined_call_operand.hbm [shape: f32[128,128], index: 3, kind: input, shape index: {}]   ;;  %s2780_s4 = inlined_call_operand.hbm [shape: f32[64,128], index: 4, kind: input, shape index: {}]   ;;  %s2781_s5 = inlined_call_operand.hbm [shape: f32[20,64], index: 5, kind: input, shape index: {}]   ;;  %s2782_s6 = inlined_call_operand.hbm [shape: f32[8,64,64], index: 6, kind: input, shape index: {}]   ;;  %s2783_s7 = inlined_call_operand.vmem [shape: f32[8,1,64], index: 7, kind: input, shape index: {}]   ;;  %s2784_s8 = inlined_call_operand.vmem [shape: f32[3,1,128], index: 8, kind: input, shape index: {}]   ;;  %s2785_s9 = inlined_call_operand.hbm [shape: f32[8,128], index: 9, kind: output, shape index: {}]  }
   0x1   :  { %15 = vsyncpa [#allocation6], 0 }
   0x2   :  { %16 = vsyncpa [#allocation9], 0 }
   0x3   :  { %17 = vsyncpa [#allocation12], 0 }
   0x4   :  { %18 = vsyncpa [#allocation4], 0  ;;  %s2354_s30 = smov [#allocation5]  }
   0x5   :  { %s34_s10 = sshll.u32 %s2354_s30, 4  ;;  %s35_s10 = int_to_ptr.vmem [resolvable:$true] %s34_s10 }
   0x6   :  { %s2192_s11 = scalar_lea.vmem %s35_s10, 640  ;;  %p2197_p1 = scmp.lt.s32.totalorder %s35_s10, %s35_s10 }
   0x7   :  { %p2193_p0 = scmp.ne.s32.totalorder %s35_s10, %s2192_s11  ;;  %p2198_p2 = scmp.lt.s32.totalorder %s2192_s11, %s2192_s11 }
   0x9   :  { %p2199_p3 = por %p2198_p2, %p2197_p1 }
   0xb   :  { %p2200_p4 = pnand %p2199_p3, %p2193_p0 }
   0xd   :  { %2203 = shalt.err (!%p2200_p4)
}
   0xe   :  { %s2355_s12 = smov 128   ;;  %s2356_s13 = smov 8  }
   0xf   :  { %40 = dma.hbm_to_vmem [thread:$0]  %s2777_s1, 640, %s35_s10, [#allocation6], %s2355_s12, %s2355_s12, %s2356_s13  }
  0x10   :  { %s2357_s16 = smov [#allocation8]   ;;  %s2358_s18 = smov [#allocation11]  }
  0x11   :  { %s56_s17 = sshll.u32 %s2357_s16, 4  ;;  %s80_s19 = sshll.u32 %s2358_s18, 4  ;;  %s57_s17 = int_to_ptr.vmem [resolvable:$true] %s56_s17  ;;  %s81_s19 = int_to_ptr.vmem [resolvable:$true] %s80_s19 }
  0x12   :  { %s2212_s20 = scalar_lea.vmem %s57_s17, 2048  ;;  %p2217_p6 = scmp.lt.s32.totalorder %s57_s17, %s57_s17 }
  0x13   :  { %p2213_p5 = scmp.ne.s32.totalorder %s57_s17, %s2212_s20  ;;  %p2218_p7 = scmp.lt.s32.totalorder %s2212_s20, %s2212_s20 }
  0x15   :  { %p2219_p8 = por %p2218_p7, %p2217_p6 }
  0x17   :  { %p2220_p9 = pnand %p2219_p8, %p2213_p5 }
  0x19   :  { %2223 = shalt.err (!%p2220_p9)
}
  0x1a   :  { %62 = dma.hbm_to_vmem [thread:$0]  %s2779_s3, 2048, %s57_s17, [#allocation9], %s2355_s12, %s2355_s12, %s2356_s13  }
  0x1b   :  { %s2232_s1 = scalar_lea.vmem %s81_s19, 384  ;;  %p2237_p11 = scmp.lt.s32.totalorder %s81_s19, %s81_s19 }
  0x1c   :  { %p2233_p10 = scmp.ne.s32.totalorder %s81_s19, %s2232_s1  ;;  %p2238_p12 = scmp.lt.s32.totalorder %s2232_s1, %s2232_s1 }
  0x1e   :  { %p2239_p13 = por %p2238_p12, %p2237_p11 }
  0x20   :  { %p2240_p0 = pnand %p2239_p13, %p2233_p10 }
  0x22   :  { %2243 = shalt.err (!%p2240_p0)
}
  0x23   :  { %86 = dma.hbm_to_vmem [thread:$0]  %s2781_s5, 384, %s81_s19, [#allocation12], %s2355_s12, %s2355_s12, %s2356_s13  }
  0x24   :  { %s2359_s25 = smov [#allocation2]   ;;  %s2360_s27 = smov [#allocation7]  }
  0x25   :  { %s25_s26 = sshll.u32 %s2359_s25, 4  ;;  %s47_s3 = sshll.u32 %s2360_s27, 4  ;;  %s26_s26 = int_to_ptr.vmem [resolvable:$true] %s25_s26  ;;  %s48_s3 = int_to_ptr.vmem [resolvable:$true] %s47_s3 }
  0x26   :  { %s2252_s28 = scalar_lea.vmem %s26_s26, 128  ;;  %p2257_p2 = scmp.lt.s32.totalorder %s26_s26, %s26_s26 }
  0x27   :  { %p2253_p1 = scmp.ne.s32.totalorder %s26_s26, %s2252_s28  ;;  %p2258_p3 = scmp.lt.s32.totalorder %s2252_s28, %s2252_s28 }
  0x29   :  { %p2259_p4 = por %p2258_p3, %p2257_p2 }
  0x2b   :  { %p2260_p5 = pnand %p2259_p4, %p2253_p1 }
  0x2d   :  { %2263 = shalt.err (!%p2260_p5)
}
  0x2e   :  { %28 = dma.hbm_to_vmem [thread:$0]  %s2776_s0, 128, %s26_s26, [#allocation3]  }
  0x2f   :  { %s2272_s10 = scalar_lea.vmem %s48_s3, 128  ;;  %p2277_p7 = scmp.lt.s32.totalorder %s48_s3, %s48_s3 }
  0x30   :  { %p2273_p6 = scmp.ne.s32.totalorder %s48_s3, %s2272_s10  ;;  %p2278_p8 = scmp.lt.s32.totalorder %s2272_s10, %s2272_s10 }
  0x32   :  { %p2279_p9 = por %p2278_p8, %p2277_p7 }
  0x34   :  { %p2280_p10 = pnand %p2279_p9, %p2273_p6 }
  0x36   :  { %2283 = shalt.err (!%p2280_p10)
}
  0x37   :  { %50 = dma.hbm_to_vmem [thread:$0]  %s2778_s2, 128, %s48_s3, [#allocation6]  }
  0x38   :  { %s2361_s14 = smov [#allocation10]   ;;  %s2362_s16 = smov [#allocation13]  }
  0x39   :  { %s68_s15 = sshll.u32 %s2361_s14, 4  ;;  %s92_s17 = sshll.u32 %s2362_s16, 4  ;;  %s69_s15 = int_to_ptr.vmem [resolvable:$true] %s68_s15  ;;  %s93_s17 = int_to_ptr.vmem [resolvable:$true] %s92_s17 }
  0x3a   :  { %s2292_s18 = scalar_lea.vmem %s69_s15, 1024  ;;  %p2297_p12 = scmp.lt.s32.totalorder %s69_s15, %s69_s15 }
  0x3b   :  { %p2293_p11 = scmp.ne.s32.totalorder %s69_s15, %s2292_s18  ;;  %p2298_p13 = scmp.lt.s32.totalorder %s2292_s18, %s2292_s18 }
  0x3d   :  { %p2299_p0 = por %p2298_p13, %p2297_p12 }
  0x3f   :  { %p2300_p1 = pnand %p2299_p0, %p2293_p11 }
  0x41   :  { %2303 = shalt.err (!%p2300_p1)
}
  0x42   :  { %74 = dma.hbm_to_vmem [thread:$0]  %s2780_s4, 1024, %s69_s15, [#allocation9], %s2355_s12, %s2355_s12, %s2356_s13  }
  0x43   :  { %s2312_s2 = scalar_lea.vmem %s93_s17, 8192  ;;  %p2317_p3 = scmp.lt.s32.totalorder %s93_s17, %s93_s17 }
  0x44   :  { %p2313_p2 = scmp.ne.s32.totalorder %s93_s17, %s2312_s2  ;;  %p2318_p4 = scmp.lt.s32.totalorder %s2312_s2, %s2312_s2 }
  0x46   :  { %p2319_p5 = por %p2318_p4, %p2317_p3 }
  0x48   :  { %p2320_p6 = pnand %p2319_p5, %p2313_p2 }
  0x4a   :  { %2323 = shalt.err (!%p2320_p6)
}
  0x4b   :  { %98 = dma.hbm_to_vmem [thread:$0]  %s2782_s6, 8192, %s93_s17, [#allocation12], %s2355_s12, %s2355_s12, %s2356_s13  }
  0x4c   :  { %2344 = dma.done.wait [#allocation3], 128  }
  0x4d   :  { %2345 = vsyncadd [#allocation3], 4294967168 }
  0x4e   :  { %2346 = dma.done.wait [#allocation6], 768  }
  0x4f   :  { %2347 = vsyncadd [#allocation6], 4294966528 }
  0x50   :  { %2348 = dma.done.wait [#allocation9], 3072  }
  0x51   :  { %2349 = vsyncadd [#allocation9], 4294964224 }
  0x52   :  { %2350 = dma.done.wait [#allocation12], 8576  }
  0x53   :  { %2351 = vsyncadd [#allocation12], 4294958720  ;;  %v2363_v0 = vmov 0.0   ;;  %vm2364_vm0 = vmmov 0   ;;  %vm234_vm1 = vcmask 64512   ;;  %v227_v1 = vld [vmem:[#allocation7] sm:$0xff] }
  0x54   :  { %1833 = vmatprep.subr.mxu0 %v2363_v0  ;;  %1835 = vmatprep.mubr.msk.f32.mxu0 %vm2364_vm0, %v2363_v0  ;;  %v226_v2 = vld [vmem:[#allocation2] sm:$0xff]  ;;  %v126_v3 = vld [vmem:[#allocation11 + $0x10] sm:$0xf]  ;;  %vm429_vm2 = vcmask 1043456   ;;  %v324_v5 = vld [vmem:[#allocation8 + $0x78] sm:$0xff]  ;;  %vm413_vm3 = vcmask 162816  }
  0x55   :  { %1838 = vmatprep.subr.mxu1 %v2363_v0  ;;  %1870 = vmatprep.mubr.msk.f32.mxu1 %vm2364_vm0, %v2363_v0  ;;  %v125_v4 = vld [vmem:[#allocation11 + $0x8] sm:$0xff]  ;;  %v323_v6 = vld [vmem:[#allocation8 + $0x70] sm:$0xff]  ;;  %v124_v7 = vld [vmem:[#allocation11] sm:$0xff]  ;;  %vm534_vm4 = vcmask 523264   ;;  %s2365_s30 = smov 64   ;;  %vm1293_vm5 = vcmask 7168  }
  0x56   :  { %1834 = vmatpush3.msra.mxu0 %v227_v1  ;;  %1839 = vmatpush3.msra.mxu1 %v324_v5  ;;  %v402_v8 = vld [vmem:[#allocation5] sm:$0xff]  ;;  %v322_v9 = vld [vmem:[#allocation8 + $0x68] sm:$0xff]  ;;  %v321_v10 = vld [vmem:[#allocation8 + $0x60] sm:$0xff]  ;;  %s2367_s18 = smov [#allocation14]  }
  0x57   :  { %1836 = vmatmul.mubr.msk.f32.vlgmr.msra.gmra.mxu0 %vm234_vm1, %v226_v2  ;;  %1873 = vmatprep.subr.mxu0 %v2363_v0  ;;  %v134_v11 = vld [vmem:[#allocation13 + $0x38] sm:$0xff]  ;;  %v403_v12 = vld [vmem:[#allocation5 + $0x8] sm:$0xff]  ;;  %v133_v15 = vld [vmem:[#allocation13 + $0x30] sm:$0xff]  ;;  %s1619_s0 = sshll.u32 %s2367_s18, 4  ;;  %s1620_s0 = int_to_ptr.vmem [resolvable:$true] %s1619_s0 }
  0x58   :  { %1874 = vmatpush3.msk.msra.mxu0 %vm429_vm2, %v126_v3  ;;  %1879 = vmatprep.mubr.msk.f32.mxu0 %vm2364_vm0, %v2363_v0  ;;  %v320_v13 = vld [vmem:[#allocation8 + $0x58] sm:$0xff]  ;;  %v319_v14 = vld [vmem:[#allocation8 + $0x50] sm:$0xff]  ;;  %v404_v16 = vld [vmem:[#allocation5 + $0x10] sm:$0xff]  ;;  %s2324_s19 = scalar_lea.vmem %s1620_s0, 128  ;;  %p2329_p8 = scmp.lt.s32.totalorder %s1620_s0, %s1620_s0 }
  0x59   :  { %1875 = vmatprep.subr.mxu0 %v2363_v0  ;;  %1840 = vmatprep.subr.mxu1 %v2363_v0  ;;  %v318_v17 = vld [vmem:[#allocation8 + $0x48] sm:$0xff]  ;;  %v317_v18 = vld [vmem:[#allocation8 + $0x40] sm:$0xff]  ;;  %v316_v21 = vld [vmem:[#allocation8 + $0x38] sm:$0xff]  ;;  %p2325_p7 = scmp.ne.s32.totalorder %s1620_s0, %s2324_s19  ;;  %p2330_p9 = scmp.lt.s32.totalorder %s2324_s19, %s2324_s19 }
  0x5a   :  { %1876 = vmatpush3.msra.mxu0 %v125_v4  ;;  %1841 = vmatpush3.msra.mxu1 %v323_v6  ;;  %v132_v19 = vld [vmem:[#allocation13 + $0x28] sm:$0xff]  ;;  %v405_v20 = vld [vmem:[#allocation5 + $0x18] sm:$0xff]  ;;  %v315_v22 = vld [vmem:[#allocation8 + $0x30] sm:$0xff] }
  0x5b   :  { %1877 = vmatprep.subr.mxu0 %v2363_v0  ;;  %1842 = vmatprep.subr.mxu1 %v2363_v0  ;;  %v131_v23 = vld [vmem:[#allocation13 + $0x20] sm:$0xff]  ;;  %v406_v24 = vld [vmem:[#allocation5 + $0x20] sm:$0xff]  ;;  %v314_v25 = vld [vmem:[#allocation8 + $0x28] sm:$0xff]  ;;  %p2331_p10 = por %p2330_p9, %p2329_p8 }
  0x5c   :  { %1878 = vmatpush3.msra.mxu0 %v124_v7  ;;  %1843 = vmatpush3.msra.mxu1 %v322_v9  ;;  %v313_v26 = vld [vmem:[#allocation8 + $0x20] sm:$0xff]  ;;  %v312_v27 = vld [vmem:[#allocation8 + $0x18] sm:$0xff]  ;;  %v311_v28 = vld [vmem:[#allocation8 + $0x10] sm:$0xff] }
  0x5d   :  { %1880 = vmatmul.mubr.msk.f32.vlgmr.msra.gmra.mxu0 %vm413_vm3, %v402_v8  ;;  %1844 = vmatprep.subr.mxu1 %v2363_v0  ;;  %v310_v29 = vld [vmem:[#allocation8 + $0x8] sm:$0xff]  ;;  %v130_v30 = vld [vmem:[#allocation13 + $0x18] sm:$0xff]  ;;  %v309_v31 = vld [vmem:[#allocation8] sm:$0xff]  ;;  %p2332_p11 = pnand %p2331_p10, %p2325_p7 }
  0x5e   :  { %1882 = vmatprep.mubr.msk.f32.mxu0 %vm2364_vm0, %v2363_v0  ;;  %1845 = vmatpush3.msra.mxu1 %v321_v10  ;;  %v129_v32 = vld [vmem:[#allocation13 + $0x10] sm:$0xff]  ;;  %v128_v33 = vld [vmem:[#allocation13 + $0x8] sm:$0xff]  ;;  %v127_v34 = vld [vmem:[#allocation13] sm:$0xff] }
  0x5f   :  { %1894 = vmatprep.subr.mxu0 %v2363_v0  ;;  %1846 = vmatprep.subr.mxu1 %v2363_v0  ;;  %v1640_v35 = vld [vmem:[%s2784_s8] ss:$0 sm:$0xff]  ;;  %v2508_v40 = vld [vmem:[#allocation13 + $0xb8] sm:$0xff]  ;;  %v2519_v45 = vld [vmem:[#allocation13 + $0xa8] sm:$0xff] }
  0x60   :  { %1895 = vmatpush3.msra.mxu0 %v134_v11  ;;  %1847 = vmatpush3.msra.mxu1 %v320_v13  ;;  %v1643_v41 = vld [vmem:[%s2783_s7] ss:$0 sm:$0xff]  ;;  %v143_v48 = vld [vmem:[#allocation13 + $0x78] sm:$0xff]  ;;  %v2524_v50 = vld [vmem:[#allocation13 + $0xa0] sm:$0xff] }
  0x61   :  { %1883 = vmatmul.mubr.msk.f32.gmra.mxu0 %vm413_vm3, %v403_v12  ;;  %1848 = vmatprep.subr.mxu1 %v2363_v0  ;;  %v2513_v42 = vld [vmem:[#allocation13 + $0xb0] sm:$0xff]  ;;  %v141_v55 = vld [vmem:[#allocation13 + $0x68] sm:$0xff]  ;;  %v2533_v57 = vld [vmem:[#allocation13 + $0x98] sm:$0xff] }
  0x62   :  { %1885 = vmatprep.mubr.msk.f32.mxu0 %vm2364_vm0, %v2363_v0  ;;  %1849 = vmatpush3.msra.mxu1 %v319_v14  ;;  %v142_v52 = vld [vmem:[#allocation13 + $0x70] sm:$0xff]  ;;  %v140_v59 = vld [vmem:[#allocation13 + $0x60] sm:$0xff]  ;;  %v146_v8 = vld [vmem:[#allocation13 + $0x88] sm:$0xff] }
  0x63   :  { %1896 = vmatprep.subr.mxu0 %v2363_v0  ;;  %1850 = vmatprep.subr.mxu1 %v2363_v0  ;;  %v147_v7 = vld [vmem:[#allocation13 + $0x90] sm:$0xff]  ;;  %v139_v9 = vld [vmem:[#allocation13 + $0x58] sm:$0xff]  ;;  %v145_v11 = vld [vmem:[#allocation13 + $0x80] sm:$0xff] }
  0x64   :  { %1897 = vmatpush3.msra.mxu0 %v133_v15  ;;  %1851 = vmatpush3.msra.mxu1 %v318_v17  ;;  %v138_v10 = vld [vmem:[#allocation13 + $0x50] sm:$0xff]  ;;  %v137_v12 = vld [vmem:[#allocation13 + $0x48] sm:$0xff]  ;;  %v136_v13 = vld [vmem:[#allocation13 + $0x40] sm:$0xff] }
  0x65   :  { %1886 = vmatmul.mubr.msk.f32.gmra.mxu0 %vm413_vm3, %v404_v16  ;;  %1852 = vmatprep.subr.mxu1 %v2363_v0  ;;  %v1642_v14 = vld [vmem:[%s2784_s8 + $0x1] ss:$0 sm:$0xff] }
  0x66   :  { %1888 = vmatprep.mubr.msk.f32.mxu0 %vm2364_vm0, %v2363_v0  ;;  %1853 = vmatpush3.msra.mxu1 %v317_v18 }
  0x67   :  { %1898 = vmatprep.subr.mxu0 %v2363_v0  ;;  %1854 = vmatprep.subr.mxu1 %v2363_v0 }
  0x68   :  { %1899 = vmatpush3.msra.mxu0 %v132_v19  ;;  %1855 = vmatpush3.msra.mxu1 %v316_v21  ;;  %v1650_v19 = vld [vmem:[%s2783_s7 + $0x1] ss:$0 sm:$0xff] }
  0x69   :  { %1889 = vmatmul.mubr.msk.f32.gmra.mxu0 %vm413_vm3, %v405_v20  ;;  %1856 = vmatprep.subr.mxu1 %v2363_v0 }
  0x6a   :  { %1891 = vmatprep.mubr.msk.f32.mxu0 %vm2364_vm0, %v2363_v0  ;;  %1857 = vmatpush3.msra.mxu1 %v315_v22 }
  0x6b   :  { %1900 = vmatprep.subr.mxu0 %v2363_v0  ;;  %1858 = vmatprep.subr.mxu1 %v2363_v0 }
  0x6c   :  { %1901 = vmatpush3.msra.mxu0 %v131_v23  ;;  %1859 = vmatpush3.msra.mxu1 %v314_v25 }
  0x6d   :  { %1892 = vmatmul.mubr.msk.f32.gmra.mxu0 %vm413_vm3, %v406_v24  ;;  %1860 = vmatprep.subr.mxu1 %v2363_v0 }
  0x6e   :  { %1902 = vmatprep.subr.mxu0 %v2363_v0  ;;  %1861 = vmatpush3.msra.mxu1 %v313_v26 }
  0x6f   :  { %1910 = vmatprep.mubr.msk.f32.mxu0 %vm2364_vm0, %v2363_v0  ;;  %1862 = vmatprep.subr.mxu1 %v2363_v0 }
  0x70   :  { %1863 = vmatpush3.msra.mxu1 %v312_v27  ;;  %1903 = vmatpush3.msra.mxu0 %v130_v30 }
  0x71   :  { %1864 = vmatprep.subr.mxu1 %v2363_v0  ;;  %1904 = vmatprep.subr.mxu0 %v2363_v0 }
  0x72   :  { %1865 = vmatpush3.msra.mxu1 %v311_v28  ;;  %1905 = vmatpush3.msra.mxu0 %v129_v32 }
  0x73   :  { %1866 = vmatprep.subr.mxu1 %v2363_v0  ;;  %1906 = vmatprep.subr.mxu0 %v2363_v0 }
  0x74   :  { %1867 = vmatpush3.msra.mxu1 %v310_v29  ;;  %1907 = vmatpush3.msra.mxu0 %v128_v33 }
  0x75   :  { %1868 = vmatprep.subr.mxu1 %v2363_v0  ;;  %1908 = vmatprep.subr.mxu0 %v2363_v0 }
  0x76   :  { %1869 = vmatpush3.msra.mxu1 %v309_v31  ;;  %1909 = vmatpush3.msra.mxu0 %v127_v34 }
  0x77   :  { %1956 = vmatprep.subr.mxu1 %v2363_v0  ;;  %1925 = vmatprep.subr.mxu0 %v2363_v0 }
 0x117   :  { %v304_v36 = vpop.f32.mrf.mxu0 }
 0x118   :  { %v305_v37 = vadd.f32 %v1640_v35, %v304_v36 }
 0x119   :  { %v1837_v38 = vpop.f32.mrf.mxu0 }
 0x11a   :  { %v308_v39 = vmax.f32 %v305_v37, 0.0 }
 0x11c   :  { %1871 = vmatmul.mubr.f32.vlgmr.msra.gmra.mxu1 %v308_v39 }
 0x11d   :  { %v499_v43 = vpop.f32.mrf.mxu0  ;;  %1957 = vmatpush3.msra.mxu1 %v2508_v40  ;;  %1972 = vmatprep.mubr.msk.f32.mxu1 %vm2364_vm0, %v2363_v0 }
 0x11e   :  { %v500_v44 = vadd.f32 %v1643_v41, %v499_v43  ;;  %1958 = vmatprep.subr.mxu1 %v2363_v0  ;;  %v222_v43 = vld [vmem:[#allocation10 + $0x20] sm:$0xff] }
 0x11f   :  { %v1881_v46 = vpop.f32.mrf.mxu0  ;;  %1959 = vmatpush3.msra.mxu1 %v2513_v42 }
 0x120   :  { %v523_v47 = vmax.f32 %v500_v44, 0.0  ;;  %1960 = vmatprep.subr.mxu1 %v2363_v0  ;;  %v221_v44 = vld [vmem:[#allocation10 + $0x18] sm:$0xff] }
 0x121   :  { %v504_v49 = vpop.f32.mrf.mxu0  ;;  %1961 = vmatpush3.msra.mxu1 %v2519_v45 }
 0x122   :  { %v505_v51 = vadd.f32 %v1643_v41, %v504_v49  ;;  %1911 = vmatmul.mubr.msk.f32.vlgmr.msra.gmra.mxu0 %vm534_vm4, %v523_v47  ;;  %1962 = vmatprep.subr.mxu1 %v2363_v0 }
 0x123   :  { %v1884_v53 = vpop.f32.mrf.mxu0  ;;  %1913 = vmatprep.mubr.msk.f32.mxu0 %vm2364_vm0, %v2363_v0  ;;  %1926 = vmatpush3.msra.mxu0 %v143_v48  ;;  %v1656_v48 = vld [vmem:[%s2783_s7 + $0x2] ss:$0 sm:$0xff] }
 0x124   :  { %v524_v54 = vmax.f32 %v505_v51, 0.0  ;;  %1927 = vmatprep.subr.mxu0 %v2363_v0  ;;  %1963 = vmatpush3.msra.mxu1 %v2524_v50 }
 0x125   :  { %v509_v56 = vpop.f32.mrf.mxu0  ;;  %1928 = vmatpush3.msra.mxu0 %v142_v52  ;;  %1964 = vmatprep.subr.mxu1 %v2363_v0 }
 0x126   :  { %v510_v58 = vadd.f32 %v1643_v41, %v509_v56  ;;  %1914 = vmatmul.mubr.msk.f32.gmra.mxu0 %vm534_vm4, %v524_v54  ;;  %1929 = vmatprep.subr.mxu0 %v2363_v0 }
 0x127   :  { %v1887_v60 = vpop.f32.mrf.mxu0  ;;  %1916 = vmatprep.mubr.msk.f32.mxu0 %vm2364_vm0, %v2363_v0  ;;  %1930 = vmatpush3.msra.mxu0 %v141_v55 }
 0x128   :  { %v525_v61 = vmax.f32 %v510_v58, 0.0  ;;  %1931 = vmatprep.subr.mxu0 %v2363_v0  ;;  %1965 = vmatpush3.msra.mxu1 %v2533_v57 }
 0x129   :  { %v514_v62 = vpop.f32.mrf.mxu0  ;;  %1932 = vmatpush3.msra.mxu0 %v140_v59  ;;  %1966 = vmatprep.subr.mxu1 %v2363_v0 }
 0x12a   :  { %v515_v63 = vadd.f32 %v1643_v41, %v514_v62  ;;  %1917 = vmatmul.mubr.msk.f32.gmra.mxu0 %vm534_vm4, %v525_v61  ;;  %1933 = vmatprep.subr.mxu0 %v2363_v0 }
 0x12b   :  { %v1890_v1 = vpop.f32.mrf.mxu0  ;;  %1919 = vmatprep.mubr.msk.f32.mxu0 %vm2364_vm0, %v2363_v0  ;;  %1967 = vmatpush3.msra.mxu1 %v147_v7 }
 0x12c   :  { %v526_v2 = vmax.f32 %v515_v63, 0.0  ;;  %1968 = vmatprep.subr.mxu1 %v2363_v0  ;;  %1934 = vmatpush3.msra.mxu0 %v139_v9  ;;  %v160_v9 = vld [vmem:[#allocation13 + $0xf0] sm:$0xff] }
 0x12d   :  { %v519_v3 = vpop.f32.mrf.mxu0  ;;  %1969 = vmatpush3.msra.mxu1 %v146_v8  ;;  %1935 = vmatprep.subr.mxu0 %v2363_v0 }
 0x12e   :  { %v520_v4 = vadd.f32 %v1643_v41, %v519_v3  ;;  %1920 = vmatmul.mubr.msk.f32.gmra.mxu0 %vm534_vm4, %v526_v2  ;;  %1970 = vmatprep.subr.mxu1 %v2363_v0  ;;  %v224_v41 = vld [vmem:[#allocation10 + $0x30] sm:$0xff] }
 0x12f   :  { %v1893_v5 = vpop.f32.mrf.mxu0  ;;  %1922 = vmatprep.mubr.msk.f32.mxu0 %vm2364_vm0, %v2363_v0  ;;  %1971 = vmatpush3.msra.mxu1 %v145_v11 }
 0x130   :  { %v527_v6 = vmax.f32 %v520_v4, 0.0  ;;  %1975 = vmatprep.subr.mxu1 %v2363_v0  ;;  %1936 = vmatpush3.msra.mxu0 %v138_v10  ;;  %v159_v10 = vld [vmem:[#allocation13 + $0xe8] sm:$0xff] }
 0x131   :  { %1937 = vmatprep.subr.mxu0 %v2363_v0 }
 0x132   :  { %1923 = vmatmul.mubr.msk.f32.gmra.mxu0 %vm534_vm4, %v527_v6  ;;  %v219_v6 = vld [vmem:[#allocation10 + $0x8] sm:$0xff] }
 0x133   :  { %1941 = vmatprep.mubr.msk.f32.mxu0 %vm2364_vm0, %v2363_v0  ;;  %1938 = vmatpush3.msra.mxu0 %v137_v12  ;;  %v157_v12 = vld [vmem:[#allocation13 + $0xd8] sm:$0xff] }
 0x134   :  { %1939 = vmatprep.subr.mxu0 %v2363_v0 }
 0x135   :  { %1940 = vmatpush3.msra.mxu0 %v136_v13  ;;  %v1662_v13 = vld [vmem:[%s2783_s7 + $0x3] ss:$0 sm:$0xff] }
 0x136   :  { %2006 = vmatprep.subr.mxu0 %v2363_v0 }
 0x1dc   :  { %v397_v15 = vpop.f32.mrf.mxu1 }
 0x1dd   :  { %v2562_v16 = vadd.f32 %v1642_v14, %v397_v15 }
 0x1de   :  { %v1872_v17 = vpop.f32.mrf.mxu1 }
 0x1df   :  { %v401_v18 = vmax.f32 %v2562_v16, 0.0  ;;  %v181_v16 = vld [vmem:[#allocation13 + $0x180] sm:$0xff] }
 0x1e1   :  { %1973 = vmatmul.mubr.msk.f32.vlgmr.msra.gmra.mxu1 %vm534_vm4, %v401_v18 }
 0x1e2   :  { %v616_v20 = vpop.f32.mrf.mxu0  ;;  %1976 = vmatpush3.msra.mxu1 %v2508_v40  ;;  %1991 = vmatprep.mubr.msk.f32.mxu1 %vm2364_vm0, %v2363_v0  ;;  %v225_v40 = vld [vmem:[#allocation10 + $0x38] sm:$0xff] }
 0x1e3   :  { %v617_v21 = vadd.f32 %v1650_v19, %v616_v20  ;;  %1977 = vmatprep.subr.mxu1 %v2363_v0 }
 0x1e4   :  { %v1912_v22 = vpop.f32.mrf.mxu0  ;;  %1978 = vmatpush3.msra.mxu1 %v2513_v42  ;;  %v223_v42 = vld [vmem:[#allocation10 + $0x28] sm:$0xff] }
 0x1e5   :  { %v640_v23 = vmax.f32 %v617_v21, 0.0  ;;  %1979 = vmatprep.subr.mxu1 %v2363_v0 }
 0x1e6   :  { %v621_v24 = vpop.f32.mrf.mxu0  ;;  %1980 = vmatpush3.msra.mxu1 %v2519_v45  ;;  %v220_v45 = vld [vmem:[#allocation10 + $0x10] sm:$0xff] }
 0x1e7   :  { %v622_v25 = vadd.f32 %v1650_v19, %v621_v24  ;;  %1942 = vmatmul.mubr.msk.f32.vlgmr.msra.gmra.mxu0 %vm534_vm4, %v640_v23  ;;  %1981 = vmatprep.subr.mxu1 %v2363_v0 }
 0x1e8   :  { %v1915_v26 = vpop.f32.mrf.mxu0  ;;  %1944 = vmatprep.mubr.msk.f32.mxu0 %vm2364_vm0, %v2363_v0  ;;  %1982 = vmatpush3.msra.mxu1 %v2524_v50 }
 0x1e9   :  { %v641_v27 = vmax.f32 %v622_v25, 0.0  ;;  %1983 = vmatprep.subr.mxu1 %v2363_v0  ;;  %2007 = vmatpush3.msra.mxu0 %v225_v40  ;;  %v170_v40 = vld [vmem:[#allocation13 + $0x138] sm:$0xff] }
 0x1ea   :  { %v626_v28 = vpop.f32.mrf.mxu0  ;;  %1984 = vmatpush3.msra.mxu1 %v2533_v57  ;;  %2008 = vmatprep.subr.mxu0 %v2363_v0 }
 0x1eb   :  { %v627_v29 = vadd.f32 %v1650_v19, %v626_v28  ;;  %1945 = vmatmul.mubr.msk.f32.gmra.mxu0 %vm534_vm4, %v641_v27  ;;  %1985 = vmatprep.subr.mxu1 %v2363_v0 }
 0x1ec   :  { %v1918_v30 = vpop.f32.mrf.mxu0  ;;  %1947 = vmatprep.mubr.msk.f32.mxu0 %vm2364_vm0, %v2363_v0  ;;  %1986 = vmatpush3.msra.mxu1 %v147_v7  ;;  %v218_v7 = vld [vmem:[#allocation10] sm:$0xff] }
 0x1ed   :  { %v642_v31 = vmax.f32 %v627_v29, 0.0  ;;  %1987 = vmatprep.subr.mxu1 %v2363_v0  ;;  %2009 = vmatpush3.msra.mxu0 %v224_v41  ;;  %v169_v41 = vld [vmem:[#allocation13 + $0x130] sm:$0xff] }
 0x1ee   :  { %v631_v32 = vpop.f32.mrf.mxu0  ;;  %1988 = vmatpush3.msra.mxu1 %v146_v8  ;;  %2010 = vmatprep.subr.mxu0 %v2363_v0  ;;  %v161_v8 = vld [vmem:[#allocation13 + $0xf8] sm:$0xff] }
 0x1ef   :  { %v632_v33 = vadd.f32 %v1650_v19, %v631_v32  ;;  %1948 = vmatmul.mubr.msk.f32.gmra.mxu0 %vm534_vm4, %v642_v31  ;;  %1989 = vmatprep.subr.mxu1 %v2363_v0 }
 0x1f0   :  { %v1921_v34 = vpop.f32.mrf.mxu0  ;;  %1950 = vmatprep.mubr.msk.f32.mxu0 %vm2364_vm0, %v2363_v0  ;;  %1990 = vmatpush3.msra.mxu1 %v145_v11  ;;  %v158_v11 = vld [vmem:[#allocation13 + $0xe0] sm:$0xff] }
 0x1f1   :  { %v643_v35 = vmax.f32 %v632_v33, 0.0  ;;  %2037 = vmatprep.subr.mxu1 %v2363_v0  ;;  %2011 = vmatpush3.msra.mxu0 %v223_v42  ;;  %v168_v42 = vld [vmem:[#allocation13 + $0x128] sm:$0xff] }
 0x1f2   :  { %v636_v36 = vpop.f32.mrf.mxu0  ;;  %2012 = vmatprep.subr.mxu0 %v2363_v0 }
 0x1f3   :  { %v637_v37 = vadd.f32 %v1650_v19, %v636_v36  ;;  %1951 = vmatmul.mubr.msk.f32.gmra.mxu0 %vm534_vm4, %v643_v35 }
 0x1f4   :  { %v1924_v38 = vpop.f32.mrf.mxu0  ;;  %1953 = vmatprep.mubr.msk.f32.mxu0 %vm2364_vm0, %v2363_v0  ;;  %2013 = vmatpush3.msra.mxu0 %v222_v43  ;;  %v167_v43 = vld [vmem:[#allocation13 + $0x120] sm:$0xff] }
 0x1f5   :  { %v644_v39 = vmax.f32 %v637_v37, 0.0  ;;  %2014 = vmatprep.subr.mxu0 %v2363_v0  ;;  %v156_v37 = vld [vmem:[#allocation13 + $0xd0] sm:$0xff]  ;;  %v155_v38 = vld [vmem:[#allocation13 + $0xc8] sm:$0xff] }
 0x1f6   :  { %2015 = vmatpush3.msra.mxu0 %v221_v44  ;;  %v166_v44 = vld [vmem:[#allocation13 + $0x118] sm:$0xff] }
 0x1f7   :  { %1954 = vmatmul.mubr.msk.f32.gmra.mxu0 %vm534_vm4, %v644_v39  ;;  %2016 = vmatprep.subr.mxu0 %v2363_v0  ;;  %v154_v39 = vld [vmem:[#allocation13 + $0xc0] sm:$0xff] }
 0x1f8   :  { %2022 = vmatprep.mubr.msk.f32.mxu0 %vm2364_vm0, %v2363_v0  ;;  %2017 = vmatpush3.msra.mxu0 %v220_v45  ;;  %v165_v45 = vld [vmem:[#allocation13 + $0x110] sm:$0xff] }
 0x1f9   :  { %2018 = vmatprep.subr.mxu0 %v2363_v0 }
 0x1fa   :  { %2019 = vmatpush3.msra.mxu0 %v219_v6 }
 0x1fb   :  { %2020 = vmatprep.subr.mxu0 %v2363_v0 }
 0x1fc   :  { %2021 = vmatpush3.msra.mxu0 %v218_v7 }
 0x1fd   :  { %2068 = vmatprep.subr.mxu0 %v2363_v0 }
 0x2a1   :  { %v836_v46 = vpop.f32.mrf.mxu1 }
 0x2a2   :  { %v837_v14 = vadd.f32 %v1662_v13, %v836_v46  ;;  %v164_v46 = vld [vmem:[#allocation13 + $0x108] sm:$0xff] }
 0x2a3   :  { %v1974_v47 = vpop.f32.mrf.mxu1 }
 0x2a4   :  { %v163_v47 = vld [vmem:[#allocation13 + $0x100] sm:$0xff] }
 0x2a7   :  { %v732_v49 = vpop.f32.mrf.mxu0 }
 0x2a8   :  { %v733_v50 = vadd.f32 %v1656_v48, %v732_v49 }
 0x2a9   :  { %v1943_v51 = vpop.f32.mrf.mxu0 }
 0x2aa   :  { %v756_v52 = vmax.f32 %v733_v50, 0.0 }
 0x2ab   :  { %v737_v53 = vpop.f32.mrf.mxu0 }
 0x2ac   :  { %v738_v54 = vadd.f32 %v1656_v48, %v737_v53  ;;  %1992 = vmatmul.mubr.msk.f32.vlgmr.msra.gmra.mxu1 %vm534_vm4, %v756_v52 }
 0x2ad   :  { %v1946_v55 = vpop.f32.mrf.mxu0  ;;  %1994 = vmatprep.mubr.msk.f32.mxu1 %vm2364_vm0, %v2363_v0  ;;  %2038 = vmatpush3.msra.mxu1 %v161_v8 }
 0x2ae   :  { %v757_v56 = vmax.f32 %v738_v54, 0.0  ;;  %2039 = vmatprep.subr.mxu1 %v2363_v0 }
 0x2af   :  { %v742_v57 = vpop.f32.mrf.mxu0  ;;  %2040 = vmatpush3.msra.mxu1 %v160_v9 }
 0x2b0   :  { %v743_v58 = vadd.f32 %v1656_v48, %v742_v57  ;;  %1995 = vmatmul.mubr.msk.f32.gmra.mxu1 %vm534_vm4, %v757_v56  ;;  %2041 = vmatprep.subr.mxu1 %v2363_v0 }
 0x2b1   :  { %v1949_v59 = vpop.f32.mrf.mxu0  ;;  %1997 = vmatprep.mubr.msk.f32.mxu1 %vm2364_vm0, %v2363_v0  ;;  %2042 = vmatpush3.msra.mxu1 %v159_v10 }
 0x2b2   :  { %v758_v60 = vmax.f32 %v743_v58, 0.0  ;;  %2043 = vmatprep.subr.mxu1 %v2363_v0 }
 0x2b3   :  { %v747_v61 = vpop.f32.mrf.mxu0  ;;  %2044 = vmatpush3.msra.mxu1 %v158_v11 }
 0x2b4   :  { %v748_v62 = vadd.f32 %v1656_v48, %v747_v61  ;;  %1998 = vmatmul.mubr.msk.f32.gmra.mxu1 %vm534_vm4, %v758_v60  ;;  %2045 = vmatprep.subr.mxu1 %v2363_v0 }
 0x2b5   :  { %v1952_v63 = vpop.f32.mrf.mxu0  ;;  %2000 = vmatprep.mubr.msk.f32.mxu1 %vm2364_vm0, %v2363_v0  ;;  %2046 = vmatpush3.msra.mxu1 %v157_v12 }
 0x2b6   :  { %v759_v1 = vmax.f32 %v748_v62, 0.0  ;;  %2047 = vmatprep.subr.mxu1 %v2363_v0 }
 0x2b7   :  { %v752_v2 = vpop.f32.mrf.mxu0  ;;  %2048 = vmatpush3.msra.mxu1 %v156_v37 }
 0x2b8   :  { %v753_v3 = vadd.f32 %v1656_v48, %v752_v2  ;;  %2001 = vmatmul.mubr.msk.f32.gmra.mxu1 %vm534_vm4, %v759_v1  ;;  %2049 = vmatprep.subr.mxu1 %v2363_v0  ;;  %v1669_v48 = vld [vmem:[%s2784_s8 + $0x2] ss:$0 sm:$0xff] }
 0x2b9   :  { %v1955_v4 = vpop.f32.mrf.mxu0  ;;  %2003 = vmatprep.mubr.msk.f32.mxu1 %vm2364_vm0, %v2363_v0  ;;  %2050 = vmatpush3.msra.mxu1 %v155_v38 }
 0x2ba   :  { %v760_v5 = vmax.f32 %v753_v3, 0.0  ;;  %2051 = vmatprep.subr.mxu1 %v2363_v0 }
 0x2bb   :  { %2052 = vmatpush3.msra.mxu1 %v154_v39 }
 0x2bc   :  { %2004 = vmatmul.mubr.msk.f32.gmra.mxu1 %vm534_vm4, %v760_v5  ;;  %2099 = vmatprep.subr.mxu1 %v2363_v0 }
 0x2bd   :  { %2053 = vmatprep.mubr.msk.f32.mxu1 %vm2364_vm0, %v2363_v0 }
 0x36c   :  { %v921_v15 = vpop.f32.mrf.mxu1 }
 0x36d   :  { %v922_v17 = vadd.f32 %v921_v15, %v837_v14 }
 0x36e   :  { %v1993_v19 = vpop.f32.mrf.mxu1 }
 0x36f   :  { %v945_v20 = vmax.f32 %v922_v17, 0.0 }
 0x370   :  { %v926_v21 = vpop.f32.mrf.mxu1 }
 0x371   :  { %v927_v22 = vadd.f32 %v926_v21, %v837_v14  ;;  %2023 = vmatmul.mubr.msk.f32.vlgmr.msra.gmra.mxu0 %vm534_vm4, %v945_v20 }
 0x372   :  { %v1996_v23 = vpop.f32.mrf.mxu1  ;;  %2025 = vmatprep.mubr.msk.f32.mxu0 %vm2364_vm0, %v2363_v0  ;;  %2069 = vmatpush3.msra.mxu0 %v170_v40 }
 0x373   :  { %v946_v24 = vmax.f32 %v927_v22, 0.0  ;;  %2070 = vmatprep.subr.mxu0 %v2363_v0  ;;  %v2366_v23 = vmov 0  }
 0x374   :  { %v931_v25 = vpop.f32.mrf.mxu1  ;;  %2071 = vmatpush3.msra.mxu0 %v169_v41  ;;  %2171 = vset.pattern.permute.xlu0 %v2366_v23 }
 0x375   :  { %v932_v26 = vadd.f32 %v931_v25, %v837_v14  ;;  %2026 = vmatmul.mubr.msk.f32.gmra.mxu0 %vm534_vm4, %v946_v24  ;;  %2072 = vmatprep.subr.mxu0 %v2363_v0  ;;  %v179_v24 = vld [vmem:[#allocation13 + $0x178] sm:$0xff]  ;;  %v178_v25 = vld [vmem:[#allocation13 + $0x170] sm:$0xff] }
 0x376   :  { %v1999_v27 = vpop.f32.mrf.mxu1  ;;  %2028 = vmatprep.mubr.msk.f32.mxu0 %vm2364_vm0, %v2363_v0  ;;  %2073 = vmatpush3.msra.mxu0 %v168_v42 }
 0x377   :  { %v947_v28 = vmax.f32 %v932_v26, 0.0  ;;  %2074 = vmatprep.subr.mxu0 %v2363_v0  ;;  %2170 = vset.pattern.permute.xlu1 %v2366_v23  ;;  %v177_v26 = vld [vmem:[#allocation13 + $0x168] sm:$0xff]  ;;  %v176_v27 = vld [vmem:[#allocation13 + $0x160] sm:$0xff] }
 0x378   :  { %v936_v29 = vpop.f32.mrf.mxu1  ;;  %2075 = vmatpush3.msra.mxu0 %v167_v43 }
 0x379   :  { %v937_v30 = vadd.f32 %v936_v29, %v837_v14  ;;  %2029 = vmatmul.mubr.msk.f32.gmra.mxu0 %vm534_vm4, %v947_v28  ;;  %2076 = vmatprep.subr.mxu0 %v2363_v0 }
 0x37a   :  { %v2002_v31 = vpop.f32.mrf.mxu1  ;;  %2031 = vmatprep.mubr.msk.f32.mxu0 %vm2364_vm0, %v2363_v0  ;;  %2077 = vmatpush3.msra.mxu0 %v166_v44 }
 0x37b   :  { %v948_v32 = vmax.f32 %v937_v30, 0.0  ;;  %2078 = vmatprep.subr.mxu0 %v2363_v0 }
 0x37c   :  { %v941_v33 = vpop.f32.mrf.mxu1  ;;  %2079 = vmatpush3.msra.mxu0 %v165_v45 }
 0x37d   :  { %v942_v34 = vadd.f32 %v941_v33, %v837_v14  ;;  %2032 = vmatmul.mubr.msk.f32.gmra.mxu0 %vm534_vm4, %v948_v32  ;;  %2080 = vmatprep.subr.mxu0 %v2363_v0 }
 0x37e   :  { %v2005_v35 = vpop.f32.mrf.mxu1  ;;  %2034 = vmatprep.mubr.msk.f32.mxu0 %vm2364_vm0, %v2363_v0  ;;  %2081 = vmatpush3.msra.mxu0 %v164_v46 }
 0x37f   :  { %v949_v36 = vmax.f32 %v942_v34, 0.0  ;;  %2082 = vmatprep.subr.mxu0 %v2363_v0  ;;  %v1681_v34 = vld [vmem:[%s2783_s7 + $0x5] ss:$0 sm:$0xff] }
 0x380   :  { %2083 = vmatpush3.msra.mxu0 %v163_v47 }
 0x381   :  { %2035 = vmatmul.mubr.msk.f32.gmra.mxu0 %vm534_vm4, %v949_v36  ;;  %2118 = vmatprep.subr.mxu0 %v2363_v0 }
 0x382   :  { %2084 = vmatprep.mubr.msk.f32.mxu0 %vm2364_vm0, %v2363_v0 }
 0x431   :  { %v1037_v49 = vpop.f32.mrf.mxu0 }
 0x432   :  { %v1038_v50 = vadd.f32 %v1669_v48, %v1037_v49 }
 0x433   :  { %v2024_v51 = vpop.f32.mrf.mxu0 }
 0x434   :  { %v1061_v52 = vmax.f32 %v1038_v50, 0.0 }
 0x435   :  { %v1042_v53 = vpop.f32.mrf.mxu0 }
 0x436   :  { %v1043_v54 = vadd.f32 %v1669_v48, %v1042_v53  ;;  %1183 = vrot.lane.b32.xlu0 %v1061_v52, %s2365_s30  ;;  %2054 = vmatmul.mubr.msk.f32.vlgmr.msra.gmra.mxu1 %vm534_vm4, %v1061_v52 }
 0x437   :  { %v2027_v55 = vpop.f32.mrf.mxu0  ;;  %2056 = vmatprep.mubr.msk.f32.mxu1 %vm2364_vm0, %v2363_v0 }
 0x438   :  { %v1062_v56 = vmax.f32 %v1043_v54, 0.0 }
 0x439   :  { %v1047_v57 = vpop.f32.mrf.mxu0 }
 0x43a   :  { %v1048_v58 = vadd.f32 %v1669_v48, %v1047_v57  ;;  %1185 = vrot.lane.b32.xlu0 %v1062_v56, %s2365_s30  ;;  %2057 = vmatmul.mubr.msk.f32.gmra.mxu1 %vm534_vm4, %v1062_v56 }
 0x43b   :  { %v2030_v59 = vpop.f32.mrf.mxu0  ;;  %2059 = vmatprep.mubr.msk.f32.mxu1 %vm2364_vm0, %v2363_v0 }
 0x43c   :  { %v1063_v60 = vmax.f32 %v1048_v58, 0.0 }
 0x43d   :  { %v1052_v61 = vpop.f32.mrf.mxu0 }
 0x43e   :  { %v1053_v62 = vadd.f32 %v1669_v48, %v1052_v61  ;;  %1187 = vrot.lane.b32.xlu1 %v1063_v60, %s2365_s30  ;;  %2060 = vmatmul.mubr.msk.f32.gmra.mxu1 %vm534_vm4, %v1063_v60 }
 0x43f   :  { %v2033_v63 = vpop.f32.mrf.mxu0  ;;  %2062 = vmatprep.mubr.msk.f32.mxu1 %vm2364_vm0, %v2363_v0 }
 0x440   :  { %v1064_v1 = vmax.f32 %v1053_v62, 0.0 }
 0x441   :  { %v1057_v2 = vpop.f32.mrf.mxu0 }
 0x442   :  { %v1058_v3 = vadd.f32 %v1669_v48, %v1057_v2  ;;  %1189 = vrot.lane.b32.xlu1 %v1064_v1, %s2365_s30  ;;  %2063 = vmatmul.mubr.msk.f32.gmra.mxu1 %vm534_vm4, %v1064_v1 }
 0x443   :  { %v2036_v4 = vpop.f32.mrf.mxu0  ;;  %2065 = vmatprep.mubr.msk.f32.mxu1 %vm2364_vm0, %v2363_v0 }
 0x444   :  { %v1065_v5 = vmax.f32 %v1058_v3, 0.0  ;;  %v175_v3 = vld [vmem:[#allocation13 + $0x158] sm:$0xff]  ;;  %v174_v4 = vld [vmem:[#allocation13 + $0x150] sm:$0xff] }
 0x446   :  { %1191 = vrot.lane.b32.xlu0 %v1065_v5, %s2365_s30  ;;  %2066 = vmatmul.mubr.msk.f32.gmra.mxu1 %vm534_vm4, %v1065_v5 }
 0x447   :  { %2115 = vmatprep.mubr.msk.f32.mxu1 %vm2364_vm0, %v2363_v0 }
 0x4a8   :  { %v1184_v6 = vpop.permute.xlu0 %1183 }
 0x4a9   :  { %2085 = vmatmul.mubr.msk.f32.vlgmr.msra.gmra.mxu0 %vm534_vm4, %v1184_v6 }
 0x4aa   :  { %2087 = vmatprep.mubr.msk.f32.mxu0 %vm2364_vm0, %v2363_v0  ;;  %2119 = vmatpush3.msra.mxu0 %v179_v24 }
 0x4ab   :  { %2120 = vmatprep.subr.mxu0 %v2363_v0 }
 0x4ac   :  { %v1186_v7 = vpop.permute.xlu0 %1185  ;;  %2121 = vmatpush3.msra.mxu0 %v178_v25  ;;  %v187_v25 = vld [vmem:[#allocation13 + $0x1b0] sm:$0xff] }
 0x4ad   :  { %2088 = vmatmul.mubr.msk.f32.gmra.mxu0 %vm534_vm4, %v1186_v7  ;;  %2122 = vmatprep.subr.mxu0 %v2363_v0 }
 0x4ae   :  { %2090 = vmatprep.mubr.msk.f32.mxu0 %vm2364_vm0, %v2363_v0  ;;  %2123 = vmatpush3.msra.mxu0 %v177_v26 }
 0x4af   :  { %2124 = vmatprep.subr.mxu0 %v2363_v0 }
 0x4b0   :  { %v1188_v8 = vpop.permute.xlu1 %1187  ;;  %2125 = vmatpush3.msra.mxu0 %v176_v27  ;;  %v186_v27 = vld [vmem:[#allocation13 + $0x1a8] sm:$0xff] }
 0x4b1   :  { %2091 = vmatmul.mubr.msk.f32.gmra.mxu0 %vm534_vm4, %v1188_v8  ;;  %2126 = vmatprep.subr.mxu0 %v2363_v0 }
 0x4b2   :  { %2093 = vmatprep.mubr.msk.f32.mxu0 %vm2364_vm0, %v2363_v0  ;;  %2127 = vmatpush3.msra.mxu0 %v175_v3 }
 0x4b3   :  { %2128 = vmatprep.subr.mxu0 %v2363_v0 }
 0x4b4   :  { %v1190_v9 = vpop.permute.xlu1 %1189  ;;  %2129 = vmatpush3.msra.mxu0 %v174_v4 }
 0x4b5   :  { %2094 = vmatmul.mubr.msk.f32.gmra.mxu0 %vm534_vm4, %v1190_v9  ;;  %2130 = vmatprep.subr.mxu0 %v2363_v0 }
 0x4b6   :  { %2096 = vmatprep.mubr.msk.f32.mxu0 %vm2364_vm0, %v2363_v0 }
 0x4b8   :  { %v1192_v10 = vpop.permute.xlu0 %1191 }
 0x4b9   :  { %2097 = vmatmul.mubr.msk.f32.gmra.mxu0 %vm534_vm4, %v1192_v10  ;;  %v188_v10 = vld [vmem:[#allocation13 + $0x1b8] sm:$0xff] }
 0x4ba   :  { %2134 = vmatprep.mubr.msk.f32.mxu0 %vm2364_vm0, %v2363_v0  ;;  %2100 = vmatpush3.msra.mxu1 %v188_v10 }
 0x4bb   :  { %2101 = vmatprep.subr.mxu1 %v2363_v0 }
 0x4bc   :  { %2102 = vmatpush3.msra.mxu1 %v187_v25 }
 0x4bd   :  { %2103 = vmatprep.subr.mxu1 %v2363_v0 }
 0x4be   :  { %2104 = vmatpush3.msra.mxu1 %v186_v27 }
 0x4bf   :  { %2105 = vmatprep.subr.mxu1 %v2363_v0 }
 0x4f6   :  { %v2699_v11 = vpop.f32.mrf.mxu1 }
 0x4f8   :  { %v2055_v12 = vpop.f32.mrf.mxu1 }
 0x4f9   :  { %v173_v12 = vld [vmem:[#allocation13 + $0x148] sm:$0xff] }
 0x4fa   :  { %v2701_v13 = vpop.f32.mrf.mxu1  ;;  %2131 = vmatpush3.msra.mxu0 %v173_v12 }
 0x4fb   :  { %2132 = vmatprep.subr.mxu0 %v2363_v0 }
 0x4fc   :  { %v2058_v14 = vpop.f32.mrf.mxu1 }
 0x4fe   :  { %v2703_v15 = vpop.f32.mrf.mxu1 }
 0x500   :  { %v2061_v17 = vpop.f32.mrf.mxu1 }
 0x502   :  { %v2705_v19 = vpop.f32.mrf.mxu1 }
 0x504   :  { %v2064_v20 = vpop.f32.mrf.mxu1 }
 0x506   :  { %v2707_v21 = vpop.f32.mrf.mxu1 }
 0x508   :  { %v2067_v22 = vpop.f32.mrf.mxu1 }
 0x509   :  { %v172_v22 = vld [vmem:[#allocation13 + $0x140] sm:$0xff] }
 0x50a   :  { %2133 = vmatpush3.msra.mxu0 %v172_v22 }
 0x569   :  { %v1269_v28 = vpop.f32.mrf.mxu0 }
 0x56a   :  { %v1270_v37 = vadd.f32 %v1681_v34, %v1269_v28  ;;  %v185_v28 = vld [vmem:[#allocation13 + $0x1a0] sm:$0xff] }
 0x56b   :  { %v2086_v29 = vpop.f32.mrf.mxu0  ;;  %2106 = vmatpush3.msra.mxu1 %v185_v28 }
 0x56c   :  { %v1294_v44 = vsel %vm1293_vm5, %v1270_v37, -inf  ;;  %v184_v29 = vld [vmem:[#allocation13 + $0x198] sm:$0xff]  ;;  %2107 = vmatprep.subr.mxu1 %v2363_v0 }
 0x56d   :  { %v1274_v30 = vpop.f32.mrf.mxu0  ;;  %2108 = vmatpush3.msra.mxu1 %v184_v29 }
 0x56e   :  { %v1275_v40 = vadd.f32 %v1681_v34, %v1274_v30  ;;  %v183_v30 = vld [vmem:[#allocation13 + $0x190] sm:$0xff]  ;;  %2109 = vmatprep.subr.mxu1 %v2363_v0 }
 0x56f   :  { %v2089_v31 = vpop.f32.mrf.mxu0  ;;  %2110 = vmatpush3.msra.mxu1 %v183_v30 }
 0x570   :  { %v1295_v48 = vsel %vm1293_vm5, %v1275_v40, -inf  ;;  %v182_v31 = vld [vmem:[#allocation13 + $0x188] sm:$0xff]  ;;  %2111 = vmatprep.subr.mxu1 %v2363_v0 }
 0x571   :  { %v1279_v32 = vpop.f32.mrf.mxu0  ;;  %2112 = vmatpush3.msra.mxu1 %v182_v31 }
 0x572   :  { %v1280_v41 = vadd.f32 %v1681_v34, %v1279_v32  ;;  %2113 = vmatprep.subr.mxu1 %v2363_v0  ;;  %v1675_v32 = vld [vmem:[%s2783_s7 + $0x4] ss:$0 sm:$0xff] }
 0x573   :  { %v2092_v33 = vpop.f32.mrf.mxu0  ;;  %2114 = vmatpush3.msra.mxu1 %v181_v16 }
 0x574   :  { %v1296_v49 = vsel %vm1293_vm5, %v1280_v41, -inf  ;;  %2137 = vmatprep.subr.mxu1 %v2363_v0  ;;  %v1154_v33 = vadd.f32 %v1675_v32, %v2699_v11  ;;  %v1174_v11 = vadd.f32 %v1675_v32, %v2707_v21  ;;  %v196_v21 = vld [vmem:[#allocation13 + $0x1f0] sm:$0xff] }
 0x575   :  { %v1284_v35 = vpop.f32.mrf.mxu0 }
 0x576   :  { %v1285_v38 = vadd.f32 %v1681_v34, %v1284_v35 }
 0x577   :  { %v2095_v36 = vpop.f32.mrf.mxu0 }
 0x578   :  { %v1297_v45 = vsel %vm1293_vm5, %v1285_v38, -inf }
 0x579   :  { %v1289_v39 = vpop.f32.mrf.mxu0  ;;  %v1301_v50 = vmax.f32 %v1296_v49, %v1297_v45 }
 0x57a   :  { %v1290_v42 = vadd.f32 %v1681_v34, %v1289_v39  ;;  %v1159_v34 = vadd.f32 %v1675_v32, %v2701_v13  ;;  %v1164_v39 = vadd.f32 %v1675_v32, %v2703_v15 }
 0x57b   :  { %v2098_v43 = vpop.f32.mrf.mxu0 }
 0x57c   :  { %v1298_v46 = vsel %vm1293_vm5, %v1290_v42, -inf }
 0x57d   :  { %v1299_v47 = vmax.f32 %v1294_v44, %v1298_v46  ;;  %v1169_v46 = vadd.f32 %v1675_v32, %v2705_v19  ;;  %v197_v19 = vld [vmem:[#allocation13 + $0x1f8] sm:$0xff] }
 0x57f   :  { %v1300_v51 = vmax.f32 %v1299_v47, %v1295_v48 }
 0x581   :  { %v1302_v52 = vmax.f32 %v1300_v51, %v1301_v50 }
 0x583   :  { %v1303_v53 = vsub.f32 %v1270_v37, %v1302_v52  ;;  %v1304_v54 = vsub.f32 %v1275_v40, %v1302_v52  ;;  %v1305_v55 = vsub.f32 %v1280_v41, %v1302_v52  ;;  %v1306_v56 = vsub.f32 %v1285_v38, %v1302_v52 }
 0x584   :  { %v1307_v57 = vsub.f32 %v1290_v42, %v1302_v52 }
 0x585   :  { %v1308_v58 = vmul.f32 1.442695, %v1303_v53  ;;  %v1310_v59 = vmul.f32 1.442695, %v1304_v54  ;;  %v1312_v60 = vmul.f32 1.442695, %v1305_v55 }
 0x586   :  { %v1314_v61 = vmul.f32 1.442695, %v1306_v56  ;;  %v1316_v62 = vmul.f32 1.442695, %v1307_v57  ;;  %v195_v57 = vld [vmem:[#allocation13 + $0x1e8] sm:$0xff] }
 0x587   :  { %2172 = vpow2.f32 %v1308_v58  ;;  %v194_v58 = vld [vmem:[#allocation13 + $0x1e0] sm:$0xff] }
 0x588   :  { %2174 = vpow2.f32 %v1310_v59  ;;  %v193_v59 = vld [vmem:[#allocation13 + $0x1d8] sm:$0xff] }
 0x589   :  { %2176 = vpow2.f32 %v1312_v60  ;;  %v192_v60 = vld [vmem:[#allocation13 + $0x1d0] sm:$0xff] }
 0x58a   :  { %2178 = vpow2.f32 %v1314_v61  ;;  %v191_v61 = vld [vmem:[#allocation13 + $0x1c8] sm:$0xff] }
 0x58b   :  { %2180 = vpow2.f32 %v1316_v62  ;;  %v190_v62 = vld [vmem:[#allocation13 + $0x1c0] sm:$0xff] }
 0x594   :  { %v2173_v63 = vpop.eup %2172 }
 0x595   :  { %v2175_v1 = vpop.eup %2174  ;;  %v1318_v2 = vsel %vm1293_vm5, %v2173_v63, 0.0  ;;  %1329 = vperm.xlu1 %2170, %v2173_v63  }
 0x596   :  { %v2177_v5 = vpop.eup %2176  ;;  %v1319_v6 = vsel %vm1293_vm5, %v2175_v1, 0.0  ;;  %1334 = vperm.xlu0 %2171, %v2175_v1  }
 0x597   :  { %v2179_v7 = vpop.eup %2178  ;;  %v1320_v8 = vadd.f32 %v1319_v6, %v1318_v2  ;;  %v1321_v9 = vsel %vm1293_vm5, %v2177_v5, 0.0  ;;  %v1689_v2 = vld [vmem:[%s2783_s7 + $0x6] ss:$0 sm:$0xff] }
 0x598   :  { %v2181_v14 = vpop.eup %2180  ;;  %v1323_v20 = vsel %vm1293_vm5, %v2179_v7, 0.0 }
 0x599   :  { %v1322_v17 = vadd.f32 %v1321_v9, %v1320_v8  ;;  %1339 = vperm.xlu1 %2170, %v2177_v5   ;;  %v1325_v24 = vsel %vm1293_vm5, %v2181_v14, 0.0  ;;  %v1690_v8 = vld [vmem:[%s2783_s7 + $0x7] ss:$0 sm:$0xff] }
 0x59a   :  { %1349 = vperm.xlu0 %2171, %v2181_v14  }
 0x59b   :  { %v1324_v23 = vadd.f32 %v1323_v20, %v1322_v17 }
 0x59d   :  { %v1326_v26 = vadd.f32 %v1325_v24, %v1324_v23  ;;  %1344 = vperm.xlu1 %2170, %v2179_v7  }
 0x59e   :  { %1446 = vrot.lane.b32.xlu0 %v401_v18, %s2365_s30 }
 0x59f   :  { %2182 = vrcp.f32 %v1326_v26 }
 0x5ac   :  { %v2183_v18 = vpop.eup %2182 }
 0x5ad   :  { %1369 = vperm.xlu1 %2170, %v2183_v18  }
 0x610   :  { %v1330_v35 = vpop.permute.xlu1 %1329 }
 0x611   :  { %v1335_v36 = vpop.permute.xlu0 %1334  ;;  %v1352_v37 = vmul.f32 %v1330_v35, %v1154_v33 }
 0x612   :  { %v1353_v38 = vmul.f32 %v1335_v36, %v1159_v34 }
 0x613   :  { %v1357_v40 = vsel %vm534_vm4, %v1352_v37, 0.0 }
 0x614   :  { %v1358_v41 = vsel %vm534_vm4, %v1353_v38, 0.0  ;;  %v1340_v42 = vpop.permute.xlu1 %1339 }
 0x615   :  { %v1359_v43 = vadd.f32 %v1358_v41, %v1357_v40  ;;  %v1350_v44 = vpop.permute.xlu0 %1349  ;;  %v1354_v45 = vmul.f32 %v1340_v42, %v1164_v39 }
 0x616   :  { %v1356_v49 = vmul.f32 %v1350_v44, %v1174_v11 }
 0x617   :  { %v1360_v13 = vsel %vm534_vm4, %v1354_v45, 0.0 }
 0x618   :  { %v1361_v47 = vadd.f32 %v1360_v13, %v1359_v43  ;;  %v1345_v48 = vpop.permute.xlu1 %1344  ;;  %v1364_v53 = vsel %vm534_vm4, %v1356_v49, 0.0 }
 0x619   :  { %v1447_v50 = vpop.permute.xlu0 %1446  ;;  %v1355_v51 = vmul.f32 %v1345_v48, %v1169_v46 }
 0x61a   :  { %2135 = vmatmul.mubr.msk.f32.vlgmr.msra.gmra.mxu0 %vm534_vm4, %v1447_v50 }
 0x61b   :  { %v1362_v15 = vsel %vm534_vm4, %v1355_v51, 0.0 }
 0x61c   :  { %v1363_v52 = vadd.f32 %v1362_v15, %v1361_v47 }
 0x61e   :  { %v1365_v54 = vadd.f32 %v1364_v53, %v1363_v52 }
 0x628   :  { %v1370_v55 = vpop.permute.xlu1 %1369 }
 0x629   :  { %v1372_v56 = vmul.f32 %v1370_v55, %v1365_v54 }
 0x62b   :  { %2116 = vmatmul.mubr.msk.f32.vlgmr.msra.gmra.mxu1 %vm534_vm4, %v1372_v56 }
 0x62c   :  { %2153 = vmatprep.mubr.msk.f32.mxu1 %vm2364_vm0, %v2363_v0  ;;  %2138 = vmatpush3.msra.mxu1 %v197_v19 }
 0x62d   :  { %2139 = vmatprep.subr.mxu1 %v2363_v0 }
 0x62e   :  { %2140 = vmatpush3.msra.mxu1 %v196_v21 }
 0x62f   :  { %2141 = vmatprep.subr.mxu1 %v2363_v0 }
 0x630   :  { %2142 = vmatpush3.msra.mxu1 %v195_v57 }
 0x631   :  { %2143 = vmatprep.subr.mxu1 %v2363_v0 }
 0x632   :  { %2144 = vmatpush3.msra.mxu1 %v194_v58 }
 0x633   :  { %2145 = vmatprep.subr.mxu1 %v2363_v0 }
 0x634   :  { %2146 = vmatpush3.msra.mxu1 %v193_v59 }
 0x635   :  { %2147 = vmatprep.subr.mxu1 %v2363_v0 }
 0x636   :  { %2148 = vmatpush3.msra.mxu1 %v192_v60 }
 0x637   :  { %2149 = vmatprep.subr.mxu1 %v2363_v0 }
 0x638   :  { %2150 = vmatpush3.msra.mxu1 %v191_v61 }
 0x639   :  { %2151 = vmatprep.subr.mxu1 %v2363_v0 }
 0x63a   :  { %2152 = vmatpush3.msra.mxu1 %v190_v62 }
 0x6da   :  { %v1516_v63 = vpop.f32.mrf.mxu0 }
 0x6dc   :  { %v2136_v1 = vpop.f32.mrf.mxu0 }
 0x6eb   :  { %v1442_v3 = vpop.f32.mrf.mxu1 }
 0x6ec   :  { %v1517_v4 = vadd.f32 %v1516_v63, %v1442_v3 }
 0x6ed   :  { %v2117_v5 = vpop.f32.mrf.mxu1 }
 0x6ee   :  { %v1526_v6 = vadd.f32 %v1689_v2, %v1517_v4 }
 0x6f0   :  { %v1527_v7 = vmax.f32 %v1526_v6, 0.0 }
 0x6f2   :  { %2154 = vmatmul.mubr.msk.f32.vlgmr.msra.gmra.mxu1 %vm534_vm4, %v1527_v7 }
 0x7b2   :  { %v1603_v9 = vpop.f32.mrf.mxu1 }
 0x7b3   :  { %v1604_v0 = vadd.f32 %v1690_v8, %v1603_v9 }
 0x7b4   :  { %v2155_v10 = vpop.f32.mrf.mxu1 }
 0x7b5   :  { %1608 = vrot.lane.b32.xlu1 %v1604_v0, %s2365_s30 }
 0x827   :  { %v1609_v12 = vpop.permute.xlu1 %1608 }
 0x828   :  { %v1611_v14 = vsel %vm534_vm4, %v1527_v7, %v1609_v12 }
 0x829   :  { %1612 = vst [vmem:[#allocation14] sm:$0xff] %v1611_v14 }
 0x82a   :  { %2335 = shalt.err (!%p2332_p11)
}
 0x82b   :  { %1622 = dma.vmem_to_hbm [thread:$0]  %s1620_s0, 128, %s2785_s9, [#allocation4]  }
 0x82c   :  { %2352 = dma.done.wait [#allocation4], 128  }
 0x82d   :  { %2353 = vsyncadd [#allocation4], 4294967168 }
 0x82e   :  { %1626 = vsyncpa [#allocation3], 1 }
 0x82f   :  { %1627 = vsyncpa [#allocation6], 1 }
 0x830   :  { %1628 = vsyncpa [#allocation9], 1 }
 0x831   :  { %1629 = vsyncpa [#allocation12], 1 }
 0x832   :  { %1630 = vsyncpa [#allocation4], 1 }

</bundles_post_ra>
